<compile_context>
chip_gen: v6e
topology: v6e:2x2x1
jax: 0.10.0
libtpu: 0.0.40
codegen_flags: <defaults>
</compile_context>

<pallas_src>
import functools

import jax
import jax.numpy as jnp
from jax import lax
from jax.experimental import pallas as pl
from jax.experimental.pallas import tpu as pltpu

EPS = 1e-5  # torch.nn.InstanceNorm2d default eps


def _dense_block_kernel(*refs, C, H, W, depth):
    # refs = (x_ref, w_ref_0..w_ref_{depth-1}, p_ref, wm_ref, o_ref, skip_ref)
    x_ref = refs[0]                      # (1, C, HW)    input, NCHW flattened
    w_refs = refs[1:1 + depth]           # (9, C, Cin_i) tap-major conv weights
    p_ref = refs[1 + depth]              # (depth, C, 4) [bias, gamma, beta, alpha]
    wm_ref = refs[2 + depth]             # (2, HW) f32 W-boundary masks
    o_ref = refs[3 + depth]              # (1, C, HW)    output (last layer)
    skip_ref = refs[4 + depth]           # (C*depth, HW) VMEM dense-skip buffer

    HW = H * W
    inv_hw = jnp.float32(1.0 / HW)
    # Flat output-position index; H-boundary validity is a flat-range test.
    idx = lax.broadcasted_iota(jnp.int32, (1, HW), 1)
    wm_left = wm_ref[0:1, :]             # valid when reading column w-1 (kw=0)
    wm_right = wm_ref[1:2, :]            # valid when reading column w+1 (kw=2)

    # Newest-first channel layout, matching torch.cat([x, skip], dim=1):
    #   block (depth-1) = original input, block (depth-2-i) = output of layer i.
    skip_ref[(depth - 1) * C:depth * C, :] = x_ref[0]

    for i in range(depth):
        d = 2 ** i
        cin = C * (i + 1)
        start = (depth - 1 - i) * C
        xin = skip_ref[start:start + cin, :]          # (cin, HW)
        w_ref = w_refs[i]

        # ---- per-layer boundary masks (hoisted, precombined, (1, HW) each) ----
        hm_up = (idx >= d * W).astype(jnp.float32)        # reading row h - d
        hm_dn = (idx < (H - d) * W).astype(jnp.float32)   # reading row h + d
        tap_masks = (
            hm_up * wm_left, hm_up, hm_up * wm_right,     # kh = 0
            wm_left,         None,  wm_right,             # kh = 1
            hm_dn * wm_left, hm_dn, hm_dn * wm_right,     # kh = 2
        )

        # ---- dilated 3x3 conv: 9 tap matmuls, chained f32 accumulation ----
        acc = jnp.zeros((C, HW), jnp.float32)
        for kh in range(3):
            dh = (kh - 1) * d                         # H offset of this tap
            for kw in range(3):
                dw = kw - 1                           # W offset of this tap
                delta = dh * W + dw                   # flat source offset
                if delta == 0:
                    src = xin
                else:
                    src = pltpu.roll(xin, (-delta) % HW, 1)   # lane rotate (XLU)
                tap = jnp.dot(w_ref[kh * 3 + kw], src,
                              preferred_element_type=jnp.float32)  # (C, HW)
                # Zero out contributions whose source position falls in the
                # (virtual) zero padding; masking the (C, HW) tap output is
                # equivalent to masking the patch columns.
                m = tap_masks[kh * 3 + kw]
                if m is not None:
                    tap = tap * m
                acc = acc + tap

        pp = p_ref[i]                                 # (C, 4)
        acc = acc + pp[:, 0:1]                        # conv bias

        # ---- InstanceNorm2d (biased variance over spatial = lane reduce) ----
        mean = jnp.sum(acc, axis=1, keepdims=True) * inv_hw   # (C, 1)
        cen = acc - mean
        var = jnp.sum(cen * cen, axis=1, keepdims=True) * inv_hw
        scale = pp[:, 1:2] * lax.rsqrt(var + EPS)     # gamma folded into scale
        y = cen * scale + pp[:, 2:3]

        # ---- PReLU (per-channel) ----
        y = jnp.where(y >= 0, y, pp[:, 3:4] * y)

        if i < depth - 1:
            # dense skip: prepend this layer's output (newest-first layout)
            skip_ref[(depth - 2 - i) * C:(depth - 1 - i) * C, :] = y
        else:
            o_ref[0] = y.astype(o_ref.dtype)


def dense_block_forward(x_nchw, layer_params):
    """DenseBlock.forward: x is NCHW (PyTorch convention)."""
    N, C, H, W = x_nchw.shape
    depth = len(layer_params)
    HW = H * W

    x_flat = x_nchw.reshape(N, C, HW)     # free reshape (NCHW is C,H*W-contiguous)

    # conv weights: (3, 3, Cin, Cout) HWIO -> (9, Cout, Cin) tap-major
    w_list = []
    for (w, b, g, be, a) in layer_params:
        kh, kw, cin, cout = w.shape
        w_list.append(jnp.transpose(w, (0, 1, 3, 2)).reshape(kh * kw, cout, cin))

    # per-channel params packed once: (depth, C, 4) = [bias, gamma, beta, alpha]
    p_all = jnp.stack([
        jnp.stack([b.reshape(-1), g.reshape(-1), be.reshape(-1), a.reshape(-1)],
                  axis=-1)
        for (w, b, g, be, a) in layer_params], axis=0)

    # W-boundary masks for the kw=0 / kw=2 taps (periodic in w -> precomputed).
    col = jnp.arange(HW, dtype=jnp.int32) % W
    wm = jnp.stack([col >= 1, col <= W - 2], axis=0).astype(jnp.float32)  # (2, HW)

    kernel = functools.partial(_dense_block_kernel, C=C, H=H, W=W, depth=depth)

    in_specs = [pl.BlockSpec((1, C, HW), lambda n: (n, 0, 0))]
    for i in range(depth):
        cin_i = C * (i + 1)
        in_specs.append(pl.BlockSpec((9, C, cin_i), lambda n: (0, 0, 0)))
    in_specs.append(pl.BlockSpec((depth, C, 4), lambda n: (0, 0, 0)))
    in_specs.append(pl.BlockSpec((2, HW), lambda n: (0, 0)))

    out = pl.pallas_call(
        kernel,
        out_shape=jax.ShapeDtypeStruct((N, C, HW), jnp.float32),
        grid=(N,),
        in_specs=in_specs,
        out_specs=pl.BlockSpec((1, C, HW), lambda n: (n, 0, 0)),
        scratch_shapes=[pltpu.VMEM((C * depth, HW), jnp.float32)],
        compiler_params=pltpu.CompilerParams(
            dimension_semantics=("parallel",)),
    )(x_flat, *w_list, p_all, wm)

    return out.reshape(N, C, H, W)


# ------------------------- pure-JAX reference ------------------------------
def reference_forward(x_nchw, layer_params):
    skip = x_nchw
    x = skip
    for i, (w, b, g, beta, a) in enumerate(layer_params):
        dil = 2 ** i
        y = lax.conv_general_dilated(
            skip, w, window_strides=(1, 1),
            padding=((dil, dil), (1, 1)),
            rhs_dilation=(dil, 1),
            dimension_numbers=('NCHW', 'HWIO', 'NCHW'))
        y = y + b.reshape(1, -1, 1, 1)
        mean = jnp.mean(y, axis=(2, 3), keepdims=True)
        var = jnp.mean((y - mean) ** 2, axis=(2, 3), keepdims=True)
        y = (y - mean) / jnp.sqrt(var + EPS)
        y = y * g.reshape(1, -1, 1, 1) + beta.reshape(1, -1, 1, 1)
        y = jnp.where(y >= 0, y, a.reshape(1, -1, 1, 1) * y)
        x = y
        skip = jnp.concatenate([x, skip], axis=1)
    return x


if __name__ == "__main__":
    N, C, H, W = 2, 8, 16, 16          # dense_channel = 8, spatial 16x16
    depth = 4

    key = jax.random.PRNGKey(0)
    k_x, k_p = jax.random.split(key)
    x = jax.random.normal(k_x, (N, C, H, W), jnp.float32)

    # Deterministic synthetic parameters (PyTorch-like init ranges).
    layer_params = []
    for i in range(depth):
        cin = C * (i + 1)
        k_p, kw_, kb_ = jax.random.split(k_p, 3)
        bound = float((cin * 9) ** -0.5)
        w = jax.random.uniform(kw_, (3, 3, cin, C), jnp.float32, -bound, bound)
        b = jax.random.uniform(kb_, (1, C), jnp.float32, -bound, bound)
        g = jnp.ones((1, C), jnp.float32)          # InstanceNorm gamma
        beta = jnp.zeros((1, C), jnp.float32)      # InstanceNorm beta
        a = jnp.full((1, C), 0.25, jnp.float32)    # PReLU default slope
        layer_params.append((w, b, g, beta, a))

    out = dense_block_forward(x, layer_params)
    out = jax.block_until_ready(out)

    ref = reference_forward(x, layer_params)
    assert out.shape == ref.shape == (N, C, H, W)
    assert jnp.allclose(out, ref, rtol=1e-4, atol=1e-4), (
        float(jnp.max(jnp.abs(out - ref))))
    print("KERNEL_OK")
</pallas_src>

<mosaic_0001>
module attributes {stable_mosaic.version = 11 : i64} {
  func.func @_dense_block_kernel(%arg0: i32, %arg1: memref<1x8x256xf32, #tpu.memory_space<vmem>>, %arg2: memref<9x8x8xf32, #tpu.memory_space<vmem>>, %arg3: memref<9x8x16xf32, #tpu.memory_space<vmem>>, %arg4: memref<9x8x24xf32, #tpu.memory_space<vmem>>, %arg5: memref<9x8x32xf32, #tpu.memory_space<vmem>>, %arg6: memref<4x8x4xf32, #tpu.memory_space<vmem>>, %arg7: memref<2x256xf32, #tpu.memory_space<vmem>>, %arg8: memref<1x8x256xf32, #tpu.memory_space<vmem>>, %arg9: memref<32x256xf32, #tpu.memory_space<vmem>>) attributes {dimension_semantics = [#tpu.dimension_semantics<parallel>], iteration_bounds = array<i64: 2>, scalar_prefetch = 0 : i64, scratch_operands = 1 : i64, tpu.core_type = #tpu.core_type<tc>, window_params = [{transform_indices = @transform_0, window_bounds = array<i64: 1, 8, 256>}, {pipeline_mode = #tpu.pipeline_mode<synchronous>, transform_indices = @transform_1, window_bounds = array<i64: 9, 8, 8>}, {pipeline_mode = #tpu.pipeline_mode<synchronous>, transform_indices = @transform_2, window_bounds = array<i64: 9, 8, 16>}, {pipeline_mode = #tpu.pipeline_mode<synchronous>, transform_indices = @transform_3, window_bounds = array<i64: 9, 8, 24>}, {pipeline_mode = #tpu.pipeline_mode<synchronous>, transform_indices = @transform_4, window_bounds = array<i64: 9, 8, 32>}, {pipeline_mode = #tpu.pipeline_mode<synchronous>, transform_indices = @transform_5, window_bounds = array<i64: 4, 8, 4>}, {pipeline_mode = #tpu.pipeline_mode<synchronous>, transform_indices = @transform_6, window_bounds = array<i64: 2, 256>}, {transform_indices = @transform_7, window_bounds = array<i64: 1, 8, 256>}]} {
    %0 = tpu.iota {dimensions = array<i32: 1>} : vector<1x256xi32>
    %c0 = arith.constant 0 : index
    %c0_0 = arith.constant 0 : index
    %1 = vector.load %arg7[%c0, %c0_0] : memref<2x256xf32, #tpu.memory_space<vmem>>, vector<1x256xf32>
    %c1 = arith.constant 1 : index
    %c0_1 = arith.constant 0 : index
    %2 = vector.load %arg7[%c1, %c0_1] : memref<2x256xf32, #tpu.memory_space<vmem>>, vector<1x256xf32>
    %c0_2 = arith.constant 0 : index
    %c0_3 = arith.constant 0 : index
    %c0_4 = arith.constant 0 : index
    %3 = vector.load %arg1[%c0_2, %c0_3, %c0_4] : memref<1x8x256xf32, #tpu.memory_space<vmem>>, vector<1x8x256xf32>
    %4 = vector.shape_cast %3 : vector<1x8x256xf32> to vector<8x256xf32>
    %c24 = arith.constant 24 : index
    %c0_5 = arith.constant 0 : index
    %5 = vector.load %arg9[%c24, %c0_5] : memref<32x256xf32, #tpu.memory_space<vmem>>, vector<8x256xf32>
    tpu.vector_store %arg9[%c24, %c0_5], %4 {strides = array<i32>} : memref<32x256xf32, #tpu.memory_space<vmem>>, vector<8x256xf32>,
    %c24_6 = arith.constant 24 : index
    %c0_7 = arith.constant 0 : index
    %6 = vector.load %arg9[%c24_6, %c0_7] : memref<32x256xf32, #tpu.memory_space<vmem>>, vector<8x256xf32>
    %c16_i32 = arith.constant 16 : i32
    %7 = vector.broadcast %c16_i32 : i32 to vector<1x256xi32>
    %8 = arith.cmpi sge, %0, %7 : vector<1x256xi32>
    %9 = arith.extui %8 : vector<1x256xi1> to vector<1x256xi32>
    %10 = arith.sitofp %9 : vector<1x256xi32> to vector<1x256xf32>
    %c240_i32 = arith.constant 240 : i32
    %11 = vector.broadcast %c240_i32 : i32 to vector<1x256xi32>
    %12 = arith.cmpi slt, %0, %11 : vector<1x256xi32>
    %13 = arith.extui %12 : vector<1x256xi1> to vector<1x256xi32>
    %14 = arith.sitofp %13 : vector<1x256xi32> to vector<1x256xf32>
    %15 = arith.mulf %10, %1 : vector<1x256xf32>
    %16 = arith.mulf %10, %2 : vector<1x256xf32>
    %17 = arith.mulf %14, %1 : vector<1x256xf32>
    %18 = arith.mulf %14, %2 : vector<1x256xf32>
    %cst = arith.constant 0.000000e+00 : f32
    %19 = vector.broadcast %cst : f32 to vector<8x256xf32>
    %c17_i32 = arith.constant 17 : i32
    %20 = tpu.dynamic_rotate %6 by %c17_i32 dim 1 : vector<8x256xf32>, i32 -> vector<8x256xf32>
    %c0_8 = arith.constant 0 : index
    %c0_9 = arith.constant 0 : index
    %c0_10 = arith.constant 0 : index
    %21 = vector.load %arg2[%c0_8, %c0_9, %c0_10] : memref<9x8x8xf32, #tpu.memory_space<vmem>>, vector<1x8x8xf32>
    %22 = vector.shape_cast %21 : vector<1x8x8xf32> to vector<8x8xf32>
    %cst_11 = arith.constant dense<0.000000e+00> : vector<8x256xf32>
    %23 = tpu.matmul %22, %20, %cst_11 {dimension_numbers = #tpu.dot_dimension_numbers<[1], [0], [0], [1], [0, 0, 1, 1], [], []>} : vector<8x8xf32>, vector<8x256xf32>, vector<8x256xf32> -> vector<8x256xf32>
    %24 = vector.broadcast %15 : vector<1x256xf32> to vector<8x256xf32>
    %25 = arith.mulf %23, %24 : vector<8x256xf32>
    %26 = arith.addf %19, %25 : vector<8x256xf32>
    %c16_i32_12 = arith.constant 16 : i32
    %27 = tpu.dynamic_rotate %6 by %c16_i32_12 dim 1 : vector<8x256xf32>, i32 -> vector<8x256xf32>
    %c1_13 = arith.constant 1 : index
    %c0_14 = arith.constant 0 : index
    %c0_15 = arith.constant 0 : index
    %28 = vector.load %arg2[%c1_13, %c0_14, %c0_15] : memref<9x8x8xf32, #tpu.memory_space<vmem>>, vector<1x8x8xf32>
    %29 = vector.shape_cast %28 : vector<1x8x8xf32> to vector<8x8xf32>
    %cst_16 = arith.constant dense<0.000000e+00> : vector<8x256xf32>
    %30 = tpu.matmul %29, %27, %cst_16 {dimension_numbers = #tpu.dot_dimension_numbers<[1], [0], [0], [1], [0, 0, 1, 1], [], []>} : vector<8x8xf32>, vector<8x256xf32>, vector<8x256xf32> -> vector<8x256xf32>
    %31 = vector.broadcast %10 : vector<1x256xf32> to vector<8x256xf32>
    %32 = arith.mulf %30, %31 : vector<8x256xf32>
    %33 = arith.addf %26, %32 : vector<8x256xf32>
    %c15_i32 = arith.constant 15 : i32
    %34 = tpu.dynamic_rotate %6 by %c15_i32 dim 1 : vector<8x256xf32>, i32 -> vector<8x256xf32>
    %c2 = arith.constant 2 : index
    %c0_17 = arith.constant 0 : index
    %c0_18 = arith.constant 0 : index
    %35 = vector.load %arg2[%c2, %c0_17, %c0_18] : memref<9x8x8xf32, #tpu.memory_space<vmem>>, vector<1x8x8xf32>
    %36 = vector.shape_cast %35 : vector<1x8x8xf32> to vector<8x8xf32>
    %cst_19 = arith.constant dense<0.000000e+00> : vector<8x256xf32>
    %37 = tpu.matmul %36, %34, %cst_19 {dimension_numbers = #tpu.dot_dimension_numbers<[1], [0], [0], [1], [0, 0, 1, 1], [], []>} : vector<8x8xf32>, vector<8x256xf32>, vector<8x256xf32> -> vector<8x256xf32>
    %38 = vector.broadcast %16 : vector<1x256xf32> to vector<8x256xf32>
    %39 = arith.mulf %37, %38 : vector<8x256xf32>
    %40 = arith.addf %33, %39 : vector<8x256xf32>
    %c1_i32 = arith.constant 1 : i32
    %41 = tpu.dynamic_rotate %6 by %c1_i32 dim 1 : vector<8x256xf32>, i32 -> vector<8x256xf32>
    %c3 = arith.constant 3 : index
    %c0_20 = arith.constant 0 : index
    %c0_21 = arith.constant 0 : index
    %42 = vector.load %arg2[%c3, %c0_20, %c0_21] : memref<9x8x8xf32, #tpu.memory_space<vmem>>, vector<1x8x8xf32>
    %43 = vector.shape_cast %42 : vector<1x8x8xf32> to vector<8x8xf32>
    %cst_22 = arith.constant dense<0.000000e+00> : vector<8x256xf32>
    %44 = tpu.matmul %43, %41, %cst_22 {dimension_numbers = #tpu.dot_dimension_numbers<[1], [0], [0], [1], [0, 0, 1, 1], [], []>} : vector<8x8xf32>, vector<8x256xf32>, vector<8x256xf32> -> vector<8x256xf32>
    %45 = vector.broadcast %1 : vector<1x256xf32> to vector<8x256xf32>
    %46 = arith.mulf %44, %45 : vector<8x256xf32>
    %47 = arith.addf %40, %46 : vector<8x256xf32>
    %c4 = arith.constant 4 : index
    %c0_23 = arith.constant 0 : index
    %c0_24 = arith.constant 0 : index
    %48 = vector.load %arg2[%c4, %c0_23, %c0_24] : memref<9x8x8xf32, #tpu.memory_space<vmem>>, vector<1x8x8xf32>
    %49 = vector.shape_cast %48 : vector<1x8x8xf32> to vector<8x8xf32>
    %cst_25 = arith.constant dense<0.000000e+00> : vector<8x256xf32>
    %50 = tpu.matmul %49, %6, %cst_25 {dimension_numbers = #tpu.dot_dimension_numbers<[1], [0], [0], [1], [0, 0, 1, 1], [], []>} : vector<8x8xf32>, vector<8x256xf32>, vector<8x256xf32> -> vector<8x256xf32>
    %51 = arith.addf %47, %50 : vector<8x256xf32>
    %c255_i32 = arith.constant 255 : i32
    %52 = tpu.dynamic_rotate %6 by %c255_i32 dim 1 : vector<8x256xf32>, i32 -> vector<8x256xf32>
    %c5 = arith.constant 5 : index
    %c0_26 = arith.constant 0 : index
    %c0_27 = arith.constant 0 : index
    %53 = vector.load %arg2[%c5, %c0_26, %c0_27] : memref<9x8x8xf32, #tpu.memory_space<vmem>>, vector<1x8x8xf32>
    %54 = vector.shape_cast %53 : vector<1x8x8xf32> to vector<8x8xf32>
    %cst_28 = arith.constant dense<0.000000e+00> : vector<8x256xf32>
    %55 = tpu.matmul %54, %52, %cst_28 {dimension_numbers = #tpu.dot_dimension_numbers<[1], [0], [0], [1], [0, 0, 1, 1], [], []>} : vector<8x8xf32>, vector<8x256xf32>, vector<8x256xf32> -> vector<8x256xf32>
    %56 = vector.broadcast %2 : vector<1x256xf32> to vector<8x256xf32>
    %57 = arith.mulf %55, %56 : vector<8x256xf32>
    %58 = arith.addf %51, %57 : vector<8x256xf32>
    %c241_i32 = arith.constant 241 : i32
    %59 = tpu.dynamic_rotate %6 by %c241_i32 dim 1 : vector<8x256xf32>, i32 -> vector<8x256xf32>
    %c6 = arith.constant 6 : index
    %c0_29 = arith.constant 0 : index
    %c0_30 = arith.constant 0 : index
    %60 = vector.load %arg2[%c6, %c0_29, %c0_30] : memref<9x8x8xf32, #tpu.memory_space<vmem>>, vector<1x8x8xf32>
    %61 = vector.shape_cast %60 : vector<1x8x8xf32> to vector<8x8xf32>
    %cst_31 = arith.constant dense<0.000000e+00> : vector<8x256xf32>
    %62 = tpu.matmul %61, %59, %cst_31 {dimension_numbers = #tpu.dot_dimension_numbers<[1], [0], [0], [1], [0, 0, 1, 1], [], []>} : vector<8x8xf32>, vector<8x256xf32>, vector<8x256xf32> -> vector<8x256xf32>
    %63 = vector.broadcast %17 : vector<1x256xf32> to vector<8x256xf32>
    %64 = arith.mulf %62, %63 : vector<8x256xf32>
    %65 = arith.addf %58, %64 : vector<8x256xf32>
    %c240_i32_32 = arith.constant 240 : i32
    %66 = tpu.dynamic_rotate %6 by %c240_i32_32 dim 1 : vector<8x256xf32>, i32 -> vector<8x256xf32>
    %c7 = arith.constant 7 : index
    %c0_33 = arith.constant 0 : index
    %c0_34 = arith.constant 0 : index
    %67 = vector.load %arg2[%c7, %c0_33, %c0_34] : memref<9x8x8xf32, #tpu.memory_space<vmem>>, vector<1x8x8xf32>
    %68 = vector.shape_cast %67 : vector<1x8x8xf32> to vector<8x8xf32>
    %cst_35 = arith.constant dense<0.000000e+00> : vector<8x256xf32>
    %69 = tpu.matmul %68, %66, %cst_35 {dimension_numbers = #tpu.dot_dimension_numbers<[1], [0], [0], [1], [0, 0, 1, 1], [], []>} : vector<8x8xf32>, vector<8x256xf32>, vector<8x256xf32> -> vector<8x256xf32>
    %70 = vector.broadcast %14 : vector<1x256xf32> to vector<8x256xf32>
    %71 = arith.mulf %69, %70 : vector<8x256xf32>
    %72 = arith.addf %65, %71 : vector<8x256xf32>
    %c239_i32 = arith.constant 239 : i32
    %73 = tpu.dynamic_rotate %6 by %c239_i32 dim 1 : vector<8x256xf32>, i32 -> vector<8x256xf32>
    %c8 = arith.constant 8 : index
    %c0_36 = arith.constant 0 : index
    %c0_37 = arith.constant 0 : index
    %74 = vector.load %arg2[%c8, %c0_36, %c0_37] : memref<9x8x8xf32, #tpu.memory_space<vmem>>, vector<1x8x8xf32>
    %75 = vector.shape_cast %74 : vector<1x8x8xf32> to vector<8x8xf32>
    %cst_38 = arith.constant dense<0.000000e+00> : vector<8x256xf32>
    %76 = tpu.matmul %75, %73, %cst_38 {dimension_numbers = #tpu.dot_dimension_numbers<[1], [0], [0], [1], [0, 0, 1, 1], [], []>} : vector<8x8xf32>, vector<8x256xf32>, vector<8x256xf32> -> vector<8x256xf32>
    %77 = vector.broadcast %18 : vector<1x256xf32> to vector<8x256xf32>
    %78 = arith.mulf %76, %77 : vector<8x256xf32>
    %79 = arith.addf %72, %78 : vector<8x256xf32>
    %c0_39 = arith.constant 0 : index
    %c0_40 = arith.constant 0 : index
    %c0_41 = arith.constant 0 : index
    %80 = vector.load %arg6[%c0_39, %c0_40, %c0_41] : memref<4x8x4xf32, #tpu.memory_space<vmem>>, vector<1x8x4xf32>
    %81 = vector.shape_cast %80 : vector<1x8x4xf32> to vector<8x4xf32>
    %82 = vector.extract_strided_slice %81 {offsets = [0, 0], sizes = [8, 1], strides = [1, 1]} : vector<8x4xf32> to vector<8x1xf32>
    %83 = vector.broadcast %82 : vector<8x1xf32> to vector<8x256xf32>
    %84 = arith.addf %79, %83 : vector<8x256xf32>
    %cst_42 = arith.constant dense<0.000000e+00> : vector<8xf32>
    %85 = vector.multi_reduction <add>, %84, %cst_42 [1] : vector<8x256xf32> to vector<8xf32>
    %86 = vector.shape_cast %85 : vector<8xf32> to vector<8x1xf32>
    %cst_43 = arith.constant 3.906250e-03 : f32
    %87 = vector.broadcast %cst_43 : f32 to vector<8x1xf32>
    %88 = arith.mulf %86, %87 : vector<8x1xf32>
    %89 = vector.broadcast %88 : vector<8x1xf32> to vector<8x256xf32>
    %90 = arith.subf %84, %89 : vector<8x256xf32>
    %91 = arith.mulf %90, %90 : vector<8x256xf32>
    %cst_44 = arith.constant dense<0.000000e+00> : vector<8xf32>
    %92 = vector.multi_reduction <add>, %91, %cst_44 [1] : vector<8x256xf32> to vector<8xf32>
    %93 = vector.shape_cast %92 : vector<8xf32> to vector<8x1xf32>
    %cst_45 = arith.constant 3.906250e-03 : f32
    %94 = vector.broadcast %cst_45 : f32 to vector<8x1xf32>
    %95 = arith.mulf %93, %94 : vector<8x1xf32>
    %96 = vector.extract_strided_slice %81 {offsets = [0, 1], sizes = [8, 1], strides = [1, 1]} : vector<8x4xf32> to vector<8x1xf32>
    %cst_46 = arith.constant 9.99999974E-6 : f32
    %97 = vector.broadcast %cst_46 : f32 to vector<8x1xf32>
    %98 = arith.addf %95, %97 : vector<8x1xf32>
    %99 = math.rsqrt %98 : vector<8x1xf32>
    %100 = arith.mulf %96, %99 : vector<8x1xf32>
    %101 = vector.broadcast %100 : vector<8x1xf32> to vector<8x256xf32>
    %102 = arith.mulf %90, %101 : vector<8x256xf32>
    %103 = vector.extract_strided_slice %81 {offsets = [0, 2], sizes = [8, 1], strides = [1, 1]} : vector<8x4xf32> to vector<8x1xf32>
    %104 = vector.broadcast %103 : vector<8x1xf32> to vector<8x256xf32>
    %105 = arith.addf %102, %104 : vector<8x256xf32>
    %cst_47 = arith.constant 0.000000e+00 : f32
    %106 = vector.broadcast %cst_47 : f32 to vector<8x256xf32>
    %107 = arith.cmpf oge, %105, %106 : vector<8x256xf32>
    %108 = vector.extract_strided_slice %81 {offsets = [0, 3], sizes = [8, 1], strides = [1, 1]} : vector<8x4xf32> to vector<8x1xf32>
    %109 = vector.broadcast %108 : vector<8x1xf32> to vector<8x256xf32>
    %110 = arith.mulf %109, %105 : vector<8x256xf32>
    %111 = arith.select %107, %105, %110 : vector<8x256xi1>, vector<8x256xf32>
    %c16 = arith.constant 16 : index
    %c0_48 = arith.constant 0 : index
    %112 = vector.load %arg9[%c16, %c0_48] : memref<32x256xf32, #tpu.memory_space<vmem>>, vector<8x256xf32>
    tpu.vector_store %arg9[%c16, %c0_48], %111 {strides = array<i32>} : memref<32x256xf32, #tpu.memory_space<vmem>>, vector<8x256xf32>,
    %c16_49 = arith.constant 16 : index
    %c0_50 = arith.constant 0 : index
    %113 = vector.load %arg9[%c16_49, %c0_50] : memref<32x256xf32, #tpu.memory_space<vmem>>, vector<16x256xf32>
    %c32_i32 = arith.constant 32 : i32
    %114 = vector.broadcast %c32_i32 : i32 to vector<1x256xi32>
    %115 = arith.cmpi sge, %0, %114 : vector<1x256xi32>
    %116 = arith.extui %115 : vector<1x256xi1> to vector<1x256xi32>
    %117 = arith.sitofp %116 : vector<1x256xi32> to vector<1x256xf32>
    %c224_i32 = arith.constant 224 : i32
    %118 = vector.broadcast %c224_i32 : i32 to vector<1x256xi32>
    %119 = arith.cmpi slt, %0, %118 : vector<1x256xi32>
    %120 = arith.extui %119 : vector<1x256xi1> to vector<1x256xi32>
    %121 = arith.sitofp %120 : vector<1x256xi32> to vector<1x256xf32>
    %122 = arith.mulf %117, %1 : vector<1x256xf32>
    %123 = arith.mulf %117, %2 : vector<1x256xf32>
    %124 = arith.mulf %121, %1 : vector<1x256xf32>
    %125 = arith.mulf %121, %2 : vector<1x256xf32>
    %cst_51 = arith.constant 0.000000e+00 : f32
    %126 = vector.broadcast %cst_51 : f32 to vector<8x256xf32>
    %c33_i32 = arith.constant 33 : i32
    %127 = tpu.dynamic_rotate %113 by %c33_i32 dim 1 : vector<16x256xf32>, i32 -> vector<16x256xf32>
    %c0_52 = arith.constant 0 : index
    %c0_53 = arith.constant 0 : index
    %c0_54 = arith.constant 0 : index
    %128 = vector.load %arg3[%c0_52, %c0_53, %c0_54] : memref<9x8x16xf32, #tpu.memory_space<vmem>>, vector<1x8x16xf32>
    %129 = vector.shape_cast %128 : vector<1x8x16xf32> to vector<8x16xf32>
    %cst_55 = arith.constant dense<0.000000e+00> : vector<8x256xf32>
    %130 = tpu.matmul %129, %127, %cst_55 {dimension_numbers = #tpu.dot_dimension_numbers<[1], [0], [0], [1], [0, 0, 1, 1], [], []>} : vector<8x16xf32>, vector<16x256xf32>, vector<8x256xf32> -> vector<8x256xf32>
    %131 = vector.broadcast %122 : vector<1x256xf32> to vector<8x256xf32>
    %132 = arith.mulf %130, %131 : vector<8x256xf32>
    %133 = arith.addf %126, %132 : vector<8x256xf32>
    %c32_i32_56 = arith.constant 32 : i32
    %134 = tpu.dynamic_rotate %113 by %c32_i32_56 dim 1 : vector<16x256xf32>, i32 -> vector<16x256xf32>
    %c1_57 = arith.constant 1 : index
    %c0_58 = arith.constant 0 : index
    %c0_59 = arith.constant 0 : index
    %135 = vector.load %arg3[%c1_57, %c0_58, %c0_59] : memref<9x8x16xf32, #tpu.memory_space<vmem>>, vector<1x8x16xf32>
    %136 = vector.shape_cast %135 : vector<1x8x16xf32> to vector<8x16xf32>
    %cst_60 = arith.constant dense<0.000000e+00> : vector<8x256xf32>
    %137 = tpu.matmul %136, %134, %cst_60 {dimension_numbers = #tpu.dot_dimension_numbers<[1], [0], [0], [1], [0, 0, 1, 1], [], []>} : vector<8x16xf32>, vector<16x256xf32>, vector<8x256xf32> -> vector<8x256xf32>
    %138 = vector.broadcast %117 : vector<1x256xf32> to vector<8x256xf32>
    %139 = arith.mulf %137, %138 : vector<8x256xf32>
    %140 = arith.addf %133, %139 : vector<8x256xf32>
    %c31_i32 = arith.constant 31 : i32
    %141 = tpu.dynamic_rotate %113 by %c31_i32 dim 1 : vector<16x256xf32>, i32 -> vector<16x256xf32>
    %c2_61 = arith.constant 2 : index
    %c0_62 = arith.constant 0 : index
    %c0_63 = arith.constant 0 : index
    %142 = vector.load %arg3[%c2_61, %c0_62, %c0_63] : memref<9x8x16xf32, #tpu.memory_space<vmem>>, vector<1x8x16xf32>
    %143 = vector.shape_cast %142 : vector<1x8x16xf32> to vector<8x16xf32>
    %cst_64 = arith.constant dense<0.000000e+00> : vector<8x256xf32>
    %144 = tpu.matmul %143, %141, %cst_64 {dimension_numbers = #tpu.dot_dimension_numbers<[1], [0], [0], [1], [0, 0, 1, 1], [], []>} : vector<8x16xf32>, vector<16x256xf32>, vector<8x256xf32> -> vector<8x256xf32>
    %145 = vector.broadcast %123 : vector<1x256xf32> to vector<8x256xf32>
    %146 = arith.mulf %144, %145 : vector<8x256xf32>
    %147 = arith.addf %140, %146 : vector<8x256xf32>
    %c1_i32_65 = arith.constant 1 : i32
    %148 = tpu.dynamic_rotate %113 by %c1_i32_65 dim 1 : vector<16x256xf32>, i32 -> vector<16x256xf32>
    %c3_66 = arith.constant 3 : index
    %c0_67 = arith.constant 0 : index
    %c0_68 = arith.constant 0 : index
    %149 = vector.load %arg3[%c3_66, %c0_67, %c0_68] : memref<9x8x16xf32, #tpu.memory_space<vmem>>, vector<1x8x16xf32>
    %150 = vector.shape_cast %149 : vector<1x8x16xf32> to vector<8x16xf32>
    %cst_69 = arith.constant dense<0.000000e+00> : vector<8x256xf32>
    %151 = tpu.matmul %150, %148, %cst_69 {dimension_numbers = #tpu.dot_dimension_numbers<[1], [0], [0], [1], [0, 0, 1, 1], [], []>} : vector<8x16xf32>, vector<16x256xf32>, vector<8x256xf32> -> vector<8x256xf32>
    %152 = vector.broadcast %1 : vector<1x256xf32> to vector<8x256xf32>
    %153 = arith.mulf %151, %152 : vector<8x256xf32>
    %154 = arith.addf %147, %153 : vector<8x256xf32>
    %c4_70 = arith.constant 4 : index
    %c0_71 = arith.constant 0 : index
    %c0_72 = arith.constant 0 : index
    %155 = vector.load %arg3[%c4_70, %c0_71, %c0_72] : memref<9x8x16xf32, #tpu.memory_space<vmem>>, vector<1x8x16xf32>
    %156 = vector.shape_cast %155 : vector<1x8x16xf32> to vector<8x16xf32>
    %cst_73 = arith.constant dense<0.000000e+00> : vector<8x256xf32>
    %157 = tpu.matmul %156, %113, %cst_73 {dimension_numbers = #tpu.dot_dimension_numbers<[1], [0], [0], [1], [0, 0, 1, 1], [], []>} : vector<8x16xf32>, vector<16x256xf32>, vector<8x256xf32> -> vector<8x256xf32>
    %158 = arith.addf %154, %157 : vector<8x256xf32>
    %c255_i32_74 = arith.constant 255 : i32
    %159 = tpu.dynamic_rotate %113 by %c255_i32_74 dim 1 : vector<16x256xf32>, i32 -> vector<16x256xf32>
    %c5_75 = arith.constant 5 : index
    %c0_76 = arith.constant 0 : index
    %c0_77 = arith.constant 0 : index
    %160 = vector.load %arg3[%c5_75, %c0_76, %c0_77] : memref<9x8x16xf32, #tpu.memory_space<vmem>>, vector<1x8x16xf32>
    %161 = vector.shape_cast %160 : vector<1x8x16xf32> to vector<8x16xf32>
    %cst_78 = arith.constant dense<0.000000e+00> : vector<8x256xf32>
    %162 = tpu.matmul %161, %159, %cst_78 {dimension_numbers = #tpu.dot_dimension_numbers<[1], [0], [0], [1], [0, 0, 1, 1], [], []>} : vector<8x16xf32>, vector<16x256xf32>, vector<8x256xf32> -> vector<8x256xf32>
    %163 = vector.broadcast %2 : vector<1x256xf32> to vector<8x256xf32>
    %164 = arith.mulf %162, %163 : vector<8x256xf32>
    %165 = arith.addf %158, %164 : vector<8x256xf32>
    %c225_i32 = arith.constant 225 : i32
    %166 = tpu.dynamic_rotate %113 by %c225_i32 dim 1 : vector<16x256xf32>, i32 -> vector<16x256xf32>
    %c6_79 = arith.constant 6 : index
    %c0_80 = arith.constant 0 : index
    %c0_81 = arith.constant 0 : index
    %167 = vector.load %arg3[%c6_79, %c0_80, %c0_81] : memref<9x8x16xf32, #tpu.memory_space<vmem>>, vector<1x8x16xf32>
    %168 = vector.shape_cast %167 : vector<1x8x16xf32> to vector<8x16xf32>
    %cst_82 = arith.constant dense<0.000000e+00> : vector<8x256xf32>
    %169 = tpu.matmul %168, %166, %cst_82 {dimension_numbers = #tpu.dot_dimension_numbers<[1], [0], [0], [1], [0, 0, 1, 1], [], []>} : vector<8x16xf32>, vector<16x256xf32>, vector<8x256xf32> -> vector<8x256xf32>
    %170 = vector.broadcast %124 : vector<1x256xf32> to vector<8x256xf32>
    %171 = arith.mulf %169, %170 : vector<8x256xf32>
    %172 = arith.addf %165, %171 : vector<8x256xf32>
    %c224_i32_83 = arith.constant 224 : i32
    %173 = tpu.dynamic_rotate %113 by %c224_i32_83 dim 1 : vector<16x256xf32>, i32 -> vector<16x256xf32>
    %c7_84 = arith.constant 7 : index
    %c0_85 = arith.constant 0 : index
    %c0_86 = arith.constant 0 : index
    %174 = vector.load %arg3[%c7_84, %c0_85, %c0_86] : memref<9x8x16xf32, #tpu.memory_space<vmem>>, vector<1x8x16xf32>
    %175 = vector.shape_cast %174 : vector<1x8x16xf32> to vector<8x16xf32>
    %cst_87 = arith.constant dense<0.000000e+00> : vector<8x256xf32>
    %176 = tpu.matmul %175, %173, %cst_87 {dimension_numbers = #tpu.dot_dimension_numbers<[1], [0], [0], [1], [0, 0, 1, 1], [], []>} : vector<8x16xf32>, vector<16x256xf32>, vector<8x256xf32> -> vector<8x256xf32>
    %177 = vector.broadcast %121 : vector<1x256xf32> to vector<8x256xf32>
    %178 = arith.mulf %176, %177 : vector<8x256xf32>
    %179 = arith.addf %172, %178 : vector<8x256xf32>
    %c223_i32 = arith.constant 223 : i32
    %180 = tpu.dynamic_rotate %113 by %c223_i32 dim 1 : vector<16x256xf32>, i32 -> vector<16x256xf32>
    %c8_88 = arith.constant 8 : index
    %c0_89 = arith.constant 0 : index
    %c0_90 = arith.constant 0 : index
    %181 = vector.load %arg3[%c8_88, %c0_89, %c0_90] : memref<9x8x16xf32, #tpu.memory_space<vmem>>, vector<1x8x16xf32>
    %182 = vector.shape_cast %181 : vector<1x8x16xf32> to vector<8x16xf32>
    %cst_91 = arith.constant dense<0.000000e+00> : vector<8x256xf32>
    %183 = tpu.matmul %182, %180, %cst_91 {dimension_numbers = #tpu.dot_dimension_numbers<[1], [0], [0], [1], [0, 0, 1, 1], [], []>} : vector<8x16xf32>, vector<16x256xf32>, vector<8x256xf32> -> vector<8x256xf32>
    %184 = vector.broadcast %125 : vector<1x256xf32> to vector<8x256xf32>
    %185 = arith.mulf %183, %184 : vector<8x256xf32>
    %186 = arith.addf %179, %185 : vector<8x256xf32>
    %c1_92 = arith.constant 1 : index
    %c0_93 = arith.constant 0 : index
    %c0_94 = arith.constant 0 : index
    %187 = vector.load %arg6[%c1_92, %c0_93, %c0_94] : memref<4x8x4xf32, #tpu.memory_space<vmem>>, vector<1x8x4xf32>
    %188 = vector.shape_cast %187 : vector<1x8x4xf32> to vector<8x4xf32>
    %189 = vector.extract_strided_slice %188 {offsets = [0, 0], sizes = [8, 1], strides = [1, 1]} : vector<8x4xf32> to vector<8x1xf32>
    %190 = vector.broadcast %189 : vector<8x1xf32> to vector<8x256xf32>
    %191 = arith.addf %186, %190 : vector<8x256xf32>
    %cst_95 = arith.constant dense<0.000000e+00> : vector<8xf32>
    %192 = vector.multi_reduction <add>, %191, %cst_95 [1] : vector<8x256xf32> to vector<8xf32>
    %193 = vector.shape_cast %192 : vector<8xf32> to vector<8x1xf32>
    %cst_96 = arith.constant 3.906250e-03 : f32
    %194 = vector.broadcast %cst_96 : f32 to vector<8x1xf32>
    %195 = arith.mulf %193, %194 : vector<8x1xf32>
    %196 = vector.broadcast %195 : vector<8x1xf32> to vector<8x256xf32>
    %197 = arith.subf %191, %196 : vector<8x256xf32>
    %198 = arith.mulf %197, %197 : vector<8x256xf32>
    %cst_97 = arith.constant dense<0.000000e+00> : vector<8xf32>
    %199 = vector.multi_reduction <add>, %198, %cst_97 [1] : vector<8x256xf32> to vector<8xf32>
    %200 = vector.shape_cast %199 : vector<8xf32> to vector<8x1xf32>
    %cst_98 = arith.constant 3.906250e-03 : f32
    %201 = vector.broadcast %cst_98 : f32 to vector<8x1xf32>
    %202 = arith.mulf %200, %201 : vector<8x1xf32>
    %203 = vector.extract_strided_slice %188 {offsets = [0, 1], sizes = [8, 1], strides = [1, 1]} : vector<8x4xf32> to vector<8x1xf32>
    %cst_99 = arith.constant 9.99999974E-6 : f32
    %204 = vector.broadcast %cst_99 : f32 to vector<8x1xf32>
    %205 = arith.addf %202, %204 : vector<8x1xf32>
    %206 = math.rsqrt %205 : vector<8x1xf32>
    %207 = arith.mulf %203, %206 : vector<8x1xf32>
    %208 = vector.broadcast %207 : vector<8x1xf32> to vector<8x256xf32>
    %209 = arith.mulf %197, %208 : vector<8x256xf32>
    %210 = vector.extract_strided_slice %188 {offsets = [0, 2], sizes = [8, 1], strides = [1, 1]} : vector<8x4xf32> to vector<8x1xf32>
    %211 = vector.broadcast %210 : vector<8x1xf32> to vector<8x256xf32>
    %212 = arith.addf %209, %211 : vector<8x256xf32>
    %cst_100 = arith.constant 0.000000e+00 : f32
    %213 = vector.broadcast %cst_100 : f32 to vector<8x256xf32>
    %214 = arith.cmpf oge, %212, %213 : vector<8x256xf32>
    %215 = vector.extract_strided_slice %188 {offsets = [0, 3], sizes = [8, 1], strides = [1, 1]} : vector<8x4xf32> to vector<8x1xf32>
    %216 = vector.broadcast %215 : vector<8x1xf32> to vector<8x256xf32>
    %217 = arith.mulf %216, %212 : vector<8x256xf32>
    %218 = arith.select %214, %212, %217 : vector<8x256xi1>, vector<8x256xf32>
    %c8_101 = arith.constant 8 : index
    %c0_102 = arith.constant 0 : index
    %219 = vector.load %arg9[%c8_101, %c0_102] : memref<32x256xf32, #tpu.memory_space<vmem>>, vector<8x256xf32>
    tpu.vector_store %arg9[%c8_101, %c0_102], %218 {strides = array<i32>} : memref<32x256xf32, #tpu.memory_space<vmem>>, vector<8x256xf32>,
    %c8_103 = arith.constant 8 : index
    %c0_104 = arith.constant 0 : index
    %220 = vector.load %arg9[%c8_103, %c0_104] : memref<32x256xf32, #tpu.memory_space<vmem>>, vector<24x256xf32>
    %c64_i32 = arith.constant 64 : i32
    %221 = vector.broadcast %c64_i32 : i32 to vector<1x256xi32>
    %222 = arith.cmpi sge, %0, %221 : vector<1x256xi32>
    %223 = arith.extui %222 : vector<1x256xi1> to vector<1x256xi32>
    %224 = arith.sitofp %223 : vector<1x256xi32> to vector<1x256xf32>
    %c192_i32 = arith.constant 192 : i32
    %225 = vector.broadcast %c192_i32 : i32 to vector<1x256xi32>
    %226 = arith.cmpi slt, %0, %225 : vector<1x256xi32>
    %227 = arith.extui %226 : vector<1x256xi1> to vector<1x256xi32>
    %228 = arith.sitofp %227 : vector<1x256xi32> to vector<1x256xf32>
    %229 = arith.mulf %224, %1 : vector<1x256xf32>
    %230 = arith.mulf %224, %2 : vector<1x256xf32>
    %231 = arith.mulf %228, %1 : vector<1x256xf32>
    %232 = arith.mulf %228, %2 : vector<1x256xf32>
    %cst_105 = arith.constant 0.000000e+00 : f32
    %233 = vector.broadcast %cst_105 : f32 to vector<8x256xf32>
    %c65_i32 = arith.constant 65 : i32
    %234 = tpu.dynamic_rotate %220 by %c65_i32 dim 1 : vector<24x256xf32>, i32 -> vector<24x256xf32>
    %c0_106 = arith.constant 0 : index
    %c0_107 = arith.constant 0 : index
    %c0_108 = arith.constant 0 : index
    %235 = vector.load %arg4[%c0_106, %c0_107, %c0_108] : memref<9x8x24xf32, #tpu.memory_space<vmem>>, vector<1x8x24xf32>
    %236 = vector.shape_cast %235 : vector<1x8x24xf32> to vector<8x24xf32>
    %cst_109 = arith.constant dense<0.000000e+00> : vector<8x256xf32>
    %237 = tpu.matmul %236, %234, %cst_109 {dimension_numbers = #tpu.dot_dimension_numbers<[1], [0], [0], [1], [0, 0, 1, 1], [], []>} : vector<8x24xf32>, vector<24x256xf32>, vector<8x256xf32> -> vector<8x256xf32>
    %238 = vector.broadcast %229 : vector<1x256xf32> to vector<8x256xf32>
    %239 = arith.mulf %237, %238 : vector<8x256xf32>
    %240 = arith.addf %233, %239 : vector<8x256xf32>
    %c64_i32_110 = arith.constant 64 : i32
    %241 = tpu.dynamic_rotate %220 by %c64_i32_110 dim 1 : vector<24x256xf32>, i32 -> vector<24x256xf32>
    %c1_111 = arith.constant 1 : index
    %c0_112 = arith.constant 0 : index
    %c0_113 = arith.constant 0 : index
    %242 = vector.load %arg4[%c1_111, %c0_112, %c0_113] : memref<9x8x24xf32, #tpu.memory_space<vmem>>, vector<1x8x24xf32>
    %243 = vector.shape_cast %242 : vector<1x8x24xf32> to vector<8x24xf32>
    %cst_114 = arith.constant dense<0.000000e+00> : vector<8x256xf32>
    %244 = tpu.matmul %243, %241, %cst_114 {dimension_numbers = #tpu.dot_dimension_numbers<[1], [0], [0], [1], [0, 0, 1, 1], [], []>} : vector<8x24xf32>, vector<24x256xf32>, vector<8x256xf32> -> vector<8x256xf32>
    %245 = vector.broadcast %224 : vector<1x256xf32> to vector<8x256xf32>
    %246 = arith.mulf %244, %245 : vector<8x256xf32>
    %247 = arith.addf %240, %246 : vector<8x256xf32>
    %c63_i32 = arith.constant 63 : i32
    %248 = tpu.dynamic_rotate %220 by %c63_i32 dim 1 : vector<24x256xf32>, i32 -> vector<24x256xf32>
    %c2_115 = arith.constant 2 : index
    %c0_116 = arith.constant 0 : index
    %c0_117 = arith.constant 0 : index
    %249 = vector.load %arg4[%c2_115, %c0_116, %c0_117] : memref<9x8x24xf32, #tpu.memory_space<vmem>>, vector<1x8x24xf32>
    %250 = vector.shape_cast %249 : vector<1x8x24xf32> to vector<8x24xf32>
    %cst_118 = arith.constant dense<0.000000e+00> : vector<8x256xf32>
    %251 = tpu.matmul %250, %248, %cst_118 {dimension_numbers = #tpu.dot_dimension_numbers<[1], [0], [0], [1], [0, 0, 1, 1], [], []>} : vector<8x24xf32>, vector<24x256xf32>, vector<8x256xf32> -> vector<8x256xf32>
    %252 = vector.broadcast %230 : vector<1x256xf32> to vector<8x256xf32>
    %253 = arith.mulf %251, %252 : vector<8x256xf32>
    %254 = arith.addf %247, %253 : vector<8x256xf32>
    %c1_i32_119 = arith.constant 1 : i32
    %255 = tpu.dynamic_rotate %220 by %c1_i32_119 dim 1 : vector<24x256xf32>, i32 -> vector<24x256xf32>
    %c3_120 = arith.constant 3 : index
    %c0_121 = arith.constant 0 : index
    %c0_122 = arith.constant 0 : index
    %256 = vector.load %arg4[%c3_120, %c0_121, %c0_122] : memref<9x8x24xf32, #tpu.memory_space<vmem>>, vector<1x8x24xf32>
    %257 = vector.shape_cast %256 : vector<1x8x24xf32> to vector<8x24xf32>
    %cst_123 = arith.constant dense<0.000000e+00> : vector<8x256xf32>
    %258 = tpu.matmul %257, %255, %cst_123 {dimension_numbers = #tpu.dot_dimension_numbers<[1], [0], [0], [1], [0, 0, 1, 1], [], []>} : vector<8x24xf32>, vector<24x256xf32>, vector<8x256xf32> -> vector<8x256xf32>
    %259 = vector.broadcast %1 : vector<1x256xf32> to vector<8x256xf32>
    %260 = arith.mulf %258, %259 : vector<8x256xf32>
    %261 = arith.addf %254, %260 : vector<8x256xf32>
    %c4_124 = arith.constant 4 : index
    %c0_125 = arith.constant 0 : index
    %c0_126 = arith.constant 0 : index
    %262 = vector.load %arg4[%c4_124, %c0_125, %c0_126] : memref<9x8x24xf32, #tpu.memory_space<vmem>>, vector<1x8x24xf32>
    %263 = vector.shape_cast %262 : vector<1x8x24xf32> to vector<8x24xf32>
    %cst_127 = arith.constant dense<0.000000e+00> : vector<8x256xf32>
    %264 = tpu.matmul %263, %220, %cst_127 {dimension_numbers = #tpu.dot_dimension_numbers<[1], [0], [0], [1], [0, 0, 1, 1], [], []>} : vector<8x24xf32>, vector<24x256xf32>, vector<8x256xf32> -> vector<8x256xf32>
    %265 = arith.addf %261, %264 : vector<8x256xf32>
    %c255_i32_128 = arith.constant 255 : i32
    %266 = tpu.dynamic_rotate %220 by %c255_i32_128 dim 1 : vector<24x256xf32>, i32 -> vector<24x256xf32>
    %c5_129 = arith.constant 5 : index
    %c0_130 = arith.constant 0 : index
    %c0_131 = arith.constant 0 : index
    %267 = vector.load %arg4[%c5_129, %c0_130, %c0_131] : memref<9x8x24xf32, #tpu.memory_space<vmem>>, vector<1x8x24xf32>
    %268 = vector.shape_cast %267 : vector<1x8x24xf32> to vector<8x24xf32>
    %cst_132 = arith.constant dense<0.000000e+00> : vector<8x256xf32>
    %269 = tpu.matmul %268, %266, %cst_132 {dimension_numbers = #tpu.dot_dimension_numbers<[1], [0], [0], [1], [0, 0, 1, 1], [], []>} : vector<8x24xf32>, vector<24x256xf32>, vector<8x256xf32> -> vector<8x256xf32>
    %270 = vector.broadcast %2 : vector<1x256xf32> to vector<8x256xf32>
    %271 = arith.mulf %269, %270 : vector<8x256xf32>
    %272 = arith.addf %265, %271 : vector<8x256xf32>
    %c193_i32 = arith.constant 193 : i32
    %273 = tpu.dynamic_rotate %220 by %c193_i32 dim 1 : vector<24x256xf32>, i32 -> vector<24x256xf32>
    %c6_133 = arith.constant 6 : index
    %c0_134 = arith.constant 0 : index
    %c0_135 = arith.constant 0 : index
    %274 = vector.load %arg4[%c6_133, %c0_134, %c0_135] : memref<9x8x24xf32, #tpu.memory_space<vmem>>, vector<1x8x24xf32>
    %275 = vector.shape_cast %274 : vector<1x8x24xf32> to vector<8x24xf32>
    %cst_136 = arith.constant dense<0.000000e+00> : vector<8x256xf32>
    %276 = tpu.matmul %275, %273, %cst_136 {dimension_numbers = #tpu.dot_dimension_numbers<[1], [0], [0], [1], [0, 0, 1, 1], [], []>} : vector<8x24xf32>, vector<24x256xf32>, vector<8x256xf32> -> vector<8x256xf32>
    %277 = vector.broadcast %231 : vector<1x256xf32> to vector<8x256xf32>
    %278 = arith.mulf %276, %277 : vector<8x256xf32>
    %279 = arith.addf %272, %278 : vector<8x256xf32>
    %c192_i32_137 = arith.constant 192 : i32
    %280 = tpu.dynamic_rotate %220 by %c192_i32_137 dim 1 : vector<24x256xf32>, i32 -> vector<24x256xf32>
    %c7_138 = arith.constant 7 : index
    %c0_139 = arith.constant 0 : index
    %c0_140 = arith.constant 0 : index
    %281 = vector.load %arg4[%c7_138, %c0_139, %c0_140] : memref<9x8x24xf32, #tpu.memory_space<vmem>>, vector<1x8x24xf32>
    %282 = vector.shape_cast %281 : vector<1x8x24xf32> to vector<8x24xf32>
    %cst_141 = arith.constant dense<0.000000e+00> : vector<8x256xf32>
    %283 = tpu.matmul %282, %280, %cst_141 {dimension_numbers = #tpu.dot_dimension_numbers<[1], [0], [0], [1], [0, 0, 1, 1], [], []>} : vector<8x24xf32>, vector<24x256xf32>, vector<8x256xf32> -> vector<8x256xf32>
    %284 = vector.broadcast %228 : vector<1x256xf32> to vector<8x256xf32>
    %285 = arith.mulf %283, %284 : vector<8x256xf32>
    %286 = arith.addf %279, %285 : vector<8x256xf32>
    %c191_i32 = arith.constant 191 : i32
    %287 = tpu.dynamic_rotate %220 by %c191_i32 dim 1 : vector<24x256xf32>, i32 -> vector<24x256xf32>
    %c8_142 = arith.constant 8 : index
    %c0_143 = arith.constant 0 : index
    %c0_144 = arith.constant 0 : index
    %288 = vector.load %arg4[%c8_142, %c0_143, %c0_144] : memref<9x8x24xf32, #tpu.memory_space<vmem>>, vector<1x8x24xf32>
    %289 = vector.shape_cast %288 : vector<1x8x24xf32> to vector<8x24xf32>
    %cst_145 = arith.constant dense<0.000000e+00> : vector<8x256xf32>
    %290 = tpu.matmul %289, %287, %cst_145 {dimension_numbers = #tpu.dot_dimension_numbers<[1], [0], [0], [1], [0, 0, 1, 1], [], []>} : vector<8x24xf32>, vector<24x256xf32>, vector<8x256xf32> -> vector<8x256xf32>
    %291 = vector.broadcast %232 : vector<1x256xf32> to vector<8x256xf32>
    %292 = arith.mulf %290, %291 : vector<8x256xf32>
    %293 = arith.addf %286, %292 : vector<8x256xf32>
    %c2_146 = arith.constant 2 : index
    %c0_147 = arith.constant 0 : index
    %c0_148 = arith.constant 0 : index
    %294 = vector.load %arg6[%c2_146, %c0_147, %c0_148] : memref<4x8x4xf32, #tpu.memory_space<vmem>>, vector<1x8x4xf32>
    %295 = vector.shape_cast %294 : vector<1x8x4xf32> to vector<8x4xf32>
    %296 = vector.extract_strided_slice %295 {offsets = [0, 0], sizes = [8, 1], strides = [1, 1]} : vector<8x4xf32> to vector<8x1xf32>
    %297 = vector.broadcast %296 : vector<8x1xf32> to vector<8x256xf32>
    %298 = arith.addf %293, %297 : vector<8x256xf32>
    %cst_149 = arith.constant dense<0.000000e+00> : vector<8xf32>
    %299 = vector.multi_reduction <add>, %298, %cst_149 [1] : vector<8x256xf32> to vector<8xf32>
    %300 = vector.shape_cast %299 : vector<8xf32> to vector<8x1xf32>
    %cst_150 = arith.constant 3.906250e-03 : f32
    %301 = vector.broadcast %cst_150 : f32 to vector<8x1xf32>
    %302 = arith.mulf %300, %301 : vector<8x1xf32>
    %303 = vector.broadcast %302 : vector<8x1xf32> to vector<8x256xf32>
    %304 = arith.subf %298, %303 : vector<8x256xf32>
    %305 = arith.mulf %304, %304 : vector<8x256xf32>
    %cst_151 = arith.constant dense<0.000000e+00> : vector<8xf32>
    %306 = vector.multi_reduction <add>, %305, %cst_151 [1] : vector<8x256xf32> to vector<8xf32>
    %307 = vector.shape_cast %306 : vector<8xf32> to vector<8x1xf32>
    %cst_152 = arith.constant 3.906250e-03 : f32
    %308 = vector.broadcast %cst_152 : f32 to vector<8x1xf32>
    %309 = arith.mulf %307, %308 : vector<8x1xf32>
    %310 = vector.extract_strided_slice %295 {offsets = [0, 1], sizes = [8, 1], strides = [1, 1]} : vector<8x4xf32> to vector<8x1xf32>
    %cst_153 = arith.constant 9.99999974E-6 : f32
    %311 = vector.broadcast %cst_153 : f32 to vector<8x1xf32>
    %312 = arith.addf %309, %311 : vector<8x1xf32>
    %313 = math.rsqrt %312 : vector<8x1xf32>
    %314 = arith.mulf %310, %313 : vector<8x1xf32>
    %315 = vector.broadcast %314 : vector<8x1xf32> to vector<8x256xf32>
    %316 = arith.mulf %304, %315 : vector<8x256xf32>
    %317 = vector.extract_strided_slice %295 {offsets = [0, 2], sizes = [8, 1], strides = [1, 1]} : vector<8x4xf32> to vector<8x1xf32>
    %318 = vector.broadcast %317 : vector<8x1xf32> to vector<8x256xf32>
    %319 = arith.addf %316, %318 : vector<8x256xf32>
    %cst_154 = arith.constant 0.000000e+00 : f32
    %320 = vector.broadcast %cst_154 : f32 to vector<8x256xf32>
    %321 = arith.cmpf oge, %319, %320 : vector<8x256xf32>
    %322 = vector.extract_strided_slice %295 {offsets = [0, 3], sizes = [8, 1], strides = [1, 1]} : vector<8x4xf32> to vector<8x1xf32>
    %323 = vector.broadcast %322 : vector<8x1xf32> to vector<8x256xf32>
    %324 = arith.mulf %323, %319 : vector<8x256xf32>
    %325 = arith.select %321, %319, %324 : vector<8x256xi1>, vector<8x256xf32>
    %c0_155 = arith.constant 0 : index
    %c0_156 = arith.constant 0 : index
    %326 = vector.load %arg9[%c0_155, %c0_156] : memref<32x256xf32, #tpu.memory_space<vmem>>, vector<8x256xf32>
    tpu.vector_store %arg9[%c0_155, %c0_156], %325 {strides = array<i32>} : memref<32x256xf32, #tpu.memory_space<vmem>>, vector<8x256xf32>,
    %c0_157 = arith.constant 0 : index
    %c0_158 = arith.constant 0 : index
    %327 = vector.load %arg9[%c0_157, %c0_158] : memref<32x256xf32, #tpu.memory_space<vmem>>, vector<32x256xf32>
    %c128_i32 = arith.constant 128 : i32
    %328 = vector.broadcast %c128_i32 : i32 to vector<1x256xi32>
    %329 = arith.cmpi sge, %0, %328 : vector<1x256xi32>
    %330 = arith.extui %329 : vector<1x256xi1> to vector<1x256xi32>
    %331 = arith.sitofp %330 : vector<1x256xi32> to vector<1x256xf32>
    %c128_i32_159 = arith.constant 128 : i32
    %332 = vector.broadcast %c128_i32_159 : i32 to vector<1x256xi32>
    %333 = arith.cmpi slt, %0, %332 : vector<1x256xi32>
    %334 = arith.extui %333 : vector<1x256xi1> to vector<1x256xi32>
    %335 = arith.sitofp %334 : vector<1x256xi32> to vector<1x256xf32>
    %336 = arith.mulf %331, %1 : vector<1x256xf32>
    %337 = arith.mulf %331, %2 : vector<1x256xf32>
    %338 = arith.mulf %335, %1 : vector<1x256xf32>
    %339 = arith.mulf %335, %2 : vector<1x256xf32>
    %cst_160 = arith.constant 0.000000e+00 : f32
    %340 = vector.broadcast %cst_160 : f32 to vector<8x256xf32>
    %c129_i32 = arith.constant 129 : i32
    %341 = tpu.dynamic_rotate %327 by %c129_i32 dim 1 : vector<32x256xf32>, i32 -> vector<32x256xf32>
    %c0_161 = arith.constant 0 : index
    %c0_162 = arith.constant 0 : index
    %c0_163 = arith.constant 0 : index
    %342 = vector.load %arg5[%c0_161, %c0_162, %c0_163] : memref<9x8x32xf32, #tpu.memory_space<vmem>>, vector<1x8x32xf32>
    %343 = vector.shape_cast %342 : vector<1x8x32xf32> to vector<8x32xf32>
    %cst_164 = arith.constant dense<0.000000e+00> : vector<8x256xf32>
    %344 = tpu.matmul %343, %341, %cst_164 {dimension_numbers = #tpu.dot_dimension_numbers<[1], [0], [0], [1], [0, 0, 1, 1], [], []>} : vector<8x32xf32>, vector<32x256xf32>, vector<8x256xf32> -> vector<8x256xf32>
    %345 = vector.broadcast %336 : vector<1x256xf32> to vector<8x256xf32>
    %346 = arith.mulf %344, %345 : vector<8x256xf32>
    %347 = arith.addf %340, %346 : vector<8x256xf32>
    %c128_i32_165 = arith.constant 128 : i32
    %348 = tpu.dynamic_rotate %327 by %c128_i32_165 dim 1 : vector<32x256xf32>, i32 -> vector<32x256xf32>
    %c1_166 = arith.constant 1 : index
    %c0_167 = arith.constant 0 : index
    %c0_168 = arith.constant 0 : index
    %349 = vector.load %arg5[%c1_166, %c0_167, %c0_168] : memref<9x8x32xf32, #tpu.memory_space<vmem>>, vector<1x8x32xf32>
    %350 = vector.shape_cast %349 : vector<1x8x32xf32> to vector<8x32xf32>
    %cst_169 = arith.constant dense<0.000000e+00> : vector<8x256xf32>
    %351 = tpu.matmul %350, %348, %cst_169 {dimension_numbers = #tpu.dot_dimension_numbers<[1], [0], [0], [1], [0, 0, 1, 1], [], []>} : vector<8x32xf32>, vector<32x256xf32>, vector<8x256xf32> -> vector<8x256xf32>
    %352 = vector.broadcast %331 : vector<1x256xf32> to vector<8x256xf32>
    %353 = arith.mulf %351, %352 : vector<8x256xf32>
    %354 = arith.addf %347, %353 : vector<8x256xf32>
    %c127_i32 = arith.constant 127 : i32
    %355 = tpu.dynamic_rotate %327 by %c127_i32 dim 1 : vector<32x256xf32>, i32 -> vector<32x256xf32>
    %c2_170 = arith.constant 2 : index
    %c0_171 = arith.constant 0 : index
    %c0_172 = arith.constant 0 : index
    %356 = vector.load %arg5[%c2_170, %c0_171, %c0_172] : memref<9x8x32xf32, #tpu.memory_space<vmem>>, vector<1x8x32xf32>
    %357 = vector.shape_cast %356 : vector<1x8x32xf32> to vector<8x32xf32>
    %cst_173 = arith.constant dense<0.000000e+00> : vector<8x256xf32>
    %358 = tpu.matmul %357, %355, %cst_173 {dimension_numbers = #tpu.dot_dimension_numbers<[1], [0], [0], [1], [0, 0, 1, 1], [], []>} : vector<8x32xf32>, vector<32x256xf32>, vector<8x256xf32> -> vector<8x256xf32>
    %359 = vector.broadcast %337 : vector<1x256xf32> to vector<8x256xf32>
    %360 = arith.mulf %358, %359 : vector<8x256xf32>
    %361 = arith.addf %354, %360 : vector<8x256xf32>
    %c1_i32_174 = arith.constant 1 : i32
    %362 = tpu.dynamic_rotate %327 by %c1_i32_174 dim 1 : vector<32x256xf32>, i32 -> vector<32x256xf32>
    %c3_175 = arith.constant 3 : index
    %c0_176 = arith.constant 0 : index
    %c0_177 = arith.constant 0 : index
    %363 = vector.load %arg5[%c3_175, %c0_176, %c0_177] : memref<9x8x32xf32, #tpu.memory_space<vmem>>, vector<1x8x32xf32>
    %364 = vector.shape_cast %363 : vector<1x8x32xf32> to vector<8x32xf32>
    %cst_178 = arith.constant dense<0.000000e+00> : vector<8x256xf32>
    %365 = tpu.matmul %364, %362, %cst_178 {dimension_numbers = #tpu.dot_dimension_numbers<[1], [0], [0], [1], [0, 0, 1, 1], [], []>} : vector<8x32xf32>, vector<32x256xf32>, vector<8x256xf32> -> vector<8x256xf32>
    %366 = vector.broadcast %1 : vector<1x256xf32> to vector<8x256xf32>
    %367 = arith.mulf %365, %366 : vector<8x256xf32>
    %368 = arith.addf %361, %367 : vector<8x256xf32>
    %c4_179 = arith.constant 4 : index
    %c0_180 = arith.constant 0 : index
    %c0_181 = arith.constant 0 : index
    %369 = vector.load %arg5[%c4_179, %c0_180, %c0_181] : memref<9x8x32xf32, #tpu.memory_space<vmem>>, vector<1x8x32xf32>
    %370 = vector.shape_cast %369 : vector<1x8x32xf32> to vector<8x32xf32>
    %cst_182 = arith.constant dense<0.000000e+00> : vector<8x256xf32>
    %371 = tpu.matmul %370, %327, %cst_182 {dimension_numbers = #tpu.dot_dimension_numbers<[1], [0], [0], [1], [0, 0, 1, 1], [], []>} : vector<8x32xf32>, vector<32x256xf32>, vector<8x256xf32> -> vector<8x256xf32>
    %372 = arith.addf %368, %371 : vector<8x256xf32>
    %c255_i32_183 = arith.constant 255 : i32
    %373 = tpu.dynamic_rotate %327 by %c255_i32_183 dim 1 : vector<32x256xf32>, i32 -> vector<32x256xf32>
    %c5_184 = arith.constant 5 : index
    %c0_185 = arith.constant 0 : index
    %c0_186 = arith.constant 0 : index
    %374 = vector.load %arg5[%c5_184, %c0_185, %c0_186] : memref<9x8x32xf32, #tpu.memory_space<vmem>>, vector<1x8x32xf32>
    %375 = vector.shape_cast %374 : vector<1x8x32xf32> to vector<8x32xf32>
    %cst_187 = arith.constant dense<0.000000e+00> : vector<8x256xf32>
    %376 = tpu.matmul %375, %373, %cst_187 {dimension_numbers = #tpu.dot_dimension_numbers<[1], [0], [0], [1], [0, 0, 1, 1], [], []>} : vector<8x32xf32>, vector<32x256xf32>, vector<8x256xf32> -> vector<8x256xf32>
    %377 = vector.broadcast %2 : vector<1x256xf32> to vector<8x256xf32>
    %378 = arith.mulf %376, %377 : vector<8x256xf32>
    %379 = arith.addf %372, %378 : vector<8x256xf32>
    %c129_i32_188 = arith.constant 129 : i32
    %380 = tpu.dynamic_rotate %327 by %c129_i32_188 dim 1 : vector<32x256xf32>, i32 -> vector<32x256xf32>
    %c6_189 = arith.constant 6 : index
    %c0_190 = arith.constant 0 : index
    %c0_191 = arith.constant 0 : index
    %381 = vector.load %arg5[%c6_189, %c0_190, %c0_191] : memref<9x8x32xf32, #tpu.memory_space<vmem>>, vector<1x8x32xf32>
    %382 = vector.shape_cast %381 : vector<1x8x32xf32> to vector<8x32xf32>
    %cst_192 = arith.constant dense<0.000000e+00> : vector<8x256xf32>
    %383 = tpu.matmul %382, %380, %cst_192 {dimension_numbers = #tpu.dot_dimension_numbers<[1], [0], [0], [1], [0, 0, 1, 1], [], []>} : vector<8x32xf32>, vector<32x256xf32>, vector<8x256xf32> -> vector<8x256xf32>
    %384 = vector.broadcast %338 : vector<1x256xf32> to vector<8x256xf32>
    %385 = arith.mulf %383, %384 : vector<8x256xf32>
    %386 = arith.addf %379, %385 : vector<8x256xf32>
    %c128_i32_193 = arith.constant 128 : i32
    %387 = tpu.dynamic_rotate %327 by %c128_i32_193 dim 1 : vector<32x256xf32>, i32 -> vector<32x256xf32>
    %c7_194 = arith.constant 7 : index
    %c0_195 = arith.constant 0 : index
    %c0_196 = arith.constant 0 : index
    %388 = vector.load %arg5[%c7_194, %c0_195, %c0_196] : memref<9x8x32xf32, #tpu.memory_space<vmem>>, vector<1x8x32xf32>
    %389 = vector.shape_cast %388 : vector<1x8x32xf32> to vector<8x32xf32>
    %cst_197 = arith.constant dense<0.000000e+00> : vector<8x256xf32>
    %390 = tpu.matmul %389, %387, %cst_197 {dimension_numbers = #tpu.dot_dimension_numbers<[1], [0], [0], [1], [0, 0, 1, 1], [], []>} : vector<8x32xf32>, vector<32x256xf32>, vector<8x256xf32> -> vector<8x256xf32>
    %391 = vector.broadcast %335 : vector<1x256xf32> to vector<8x256xf32>
    %392 = arith.mulf %390, %391 : vector<8x256xf32>
    %393 = arith.addf %386, %392 : vector<8x256xf32>
    %c127_i32_198 = arith.constant 127 : i32
    %394 = tpu.dynamic_rotate %327 by %c127_i32_198 dim 1 : vector<32x256xf32>, i32 -> vector<32x256xf32>
    %c8_199 = arith.constant 8 : index
    %c0_200 = arith.constant 0 : index
    %c0_201 = arith.constant 0 : index
    %395 = vector.load %arg5[%c8_199, %c0_200, %c0_201] : memref<9x8x32xf32, #tpu.memory_space<vmem>>, vector<1x8x32xf32>
    %396 = vector.shape_cast %395 : vector<1x8x32xf32> to vector<8x32xf32>
    %cst_202 = arith.constant dense<0.000000e+00> : vector<8x256xf32>
    %397 = tpu.matmul %396, %394, %cst_202 {dimension_numbers = #tpu.dot_dimension_numbers<[1], [0], [0], [1], [0, 0, 1, 1], [], []>} : vector<8x32xf32>, vector<32x256xf32>, vector<8x256xf32> -> vector<8x256xf32>
    %398 = vector.broadcast %339 : vector<1x256xf32> to vector<8x256xf32>
    %399 = arith.mulf %397, %398 : vector<8x256xf32>
    %400 = arith.addf %393, %399 : vector<8x256xf32>
    %c3_203 = arith.constant 3 : index
    %c0_204 = arith.constant 0 : index
    %c0_205 = arith.constant 0 : index
    %401 = vector.load %arg6[%c3_203, %c0_204, %c0_205] : memref<4x8x4xf32, #tpu.memory_space<vmem>>, vector<1x8x4xf32>
    %402 = vector.shape_cast %401 : vector<1x8x4xf32> to vector<8x4xf32>
    %403 = vector.extract_strided_slice %402 {offsets = [0, 0], sizes = [8, 1], strides = [1, 1]} : vector<8x4xf32> to vector<8x1xf32>
    %404 = vector.broadcast %403 : vector<8x1xf32> to vector<8x256xf32>
    %405 = arith.addf %400, %404 : vector<8x256xf32>
    %cst_206 = arith.constant dense<0.000000e+00> : vector<8xf32>
    %406 = vector.multi_reduction <add>, %405, %cst_206 [1] : vector<8x256xf32> to vector<8xf32>
    %407 = vector.shape_cast %406 : vector<8xf32> to vector<8x1xf32>
    %cst_207 = arith.constant 3.906250e-03 : f32
    %408 = vector.broadcast %cst_207 : f32 to vector<8x1xf32>
    %409 = arith.mulf %407, %408 : vector<8x1xf32>
    %410 = vector.broadcast %409 : vector<8x1xf32> to vector<8x256xf32>
    %411 = arith.subf %405, %410 : vector<8x256xf32>
    %412 = arith.mulf %411, %411 : vector<8x256xf32>
    %cst_208 = arith.constant dense<0.000000e+00> : vector<8xf32>
    %413 = vector.multi_reduction <add>, %412, %cst_208 [1] : vector<8x256xf32> to vector<8xf32>
    %414 = vector.shape_cast %413 : vector<8xf32> to vector<8x1xf32>
    %cst_209 = arith.constant 3.906250e-03 : f32
    %415 = vector.broadcast %cst_209 : f32 to vector<8x1xf32>
    %416 = arith.mulf %414, %415 : vector<8x1xf32>
    %417 = vector.extract_strided_slice %402 {offsets = [0, 1], sizes = [8, 1], strides = [1, 1]} : vector<8x4xf32> to vector<8x1xf32>
    %cst_210 = arith.constant 9.99999974E-6 : f32
    %418 = vector.broadcast %cst_210 : f32 to vector<8x1xf32>
    %419 = arith.addf %416, %418 : vector<8x1xf32>
    %420 = math.rsqrt %419 : vector<8x1xf32>
    %421 = arith.mulf %417, %420 : vector<8x1xf32>
    %422 = vector.broadcast %421 : vector<8x1xf32> to vector<8x256xf32>
    %423 = arith.mulf %411, %422 : vector<8x256xf32>
    %424 = vector.extract_strided_slice %402 {offsets = [0, 2], sizes = [8, 1], strides = [1, 1]} : vector<8x4xf32> to vector<8x1xf32>
    %425 = vector.broadcast %424 : vector<8x1xf32> to vector<8x256xf32>
    %426 = arith.addf %423, %425 : vector<8x256xf32>
    %cst_211 = arith.constant 0.000000e+00 : f32
    %427 = vector.broadcast %cst_211 : f32 to vector<8x256xf32>
    %428 = arith.cmpf oge, %426, %427 : vector<8x256xf32>
    %429 = vector.extract_strided_slice %402 {offsets = [0, 3], sizes = [8, 1], strides = [1, 1]} : vector<8x4xf32> to vector<8x1xf32>
    %430 = vector.broadcast %429 : vector<8x1xf32> to vector<8x256xf32>
    %431 = arith.mulf %430, %426 : vector<8x256xf32>
    %432 = arith.select %428, %426, %431 : vector<8x256xi1>, vector<8x256xf32>
    %c0_212 = arith.constant 0 : index
    %c0_213 = arith.constant 0 : index
    %c0_214 = arith.constant 0 : index
    %433 = vector.load %arg8[%c0_212, %c0_213, %c0_214] : memref<1x8x256xf32, #tpu.memory_space<vmem>>, vector<1x8x256xf32>
    %434 = vector.shape_cast %433 : vector<1x8x256xf32> to vector<8x256xf32>
    %435 = vector.shape_cast %432 : vector<8x256xf32> to vector<1x8x256xf32>
    tpu.vector_store %arg8[%c0_212, %c0_213, %c0_214], %435 {strides = array<i32>} : memref<1x8x256xf32, #tpu.memory_space<vmem>>, vector<1x8x256xf32>,
    return
  }
  func.func @transform_0(%arg0: i32) -> (i32, i32, i32) {
    %c0_i32 = arith.constant 0 : i32
    %c0_i32_0 = arith.constant 0 : i32
    %c0_i32_1 = arith.constant 0 : i32
    return %arg0, %c0_i32, %c0_i32_0 : i32, i32, i32
  }
  func.func @transform_1(%arg0: i32) -> (i32, i32, i32) {
    %c0_i32 = arith.constant 0 : i32
    %c0_i32_0 = arith.constant 0 : i32
    %c0_i32_1 = arith.constant 0 : i32
    %c0_i32_2 = arith.constant 0 : i32
    return %c0_i32, %c0_i32_0, %c0_i32_1 : i32, i32, i32
  }
  func.func @transform_2(%arg0: i32) -> (i32, i32, i32) {
    %c0_i32 = arith.constant 0 : i32
    %c0_i32_0 = arith.constant 0 : i32
    %c0_i32_1 = arith.constant 0 : i32
    %c0_i32_2 = arith.constant 0 : i32
    return %c0_i32, %c0_i32_0, %c0_i32_1 : i32, i32, i32
  }
  func.func @transform_3(%arg0: i32) -> (i32, i32, i32) {
    %c0_i32 = arith.constant 0 : i32
    %c0_i32_0 = arith.constant 0 : i32
    %c0_i32_1 = arith.constant 0 : i32
    %c0_i32_2 = arith.constant 0 : i32
    return %c0_i32, %c0_i32_0, %c0_i32_1 : i32, i32, i32
  }
  func.func @transform_4(%arg0: i32) -> (i32, i32, i32) {
    %c0_i32 = arith.constant 0 : i32
    %c0_i32_0 = arith.constant 0 : i32
    %c0_i32_1 = arith.constant 0 : i32
    %c0_i32_2 = arith.constant 0 : i32
    return %c0_i32, %c0_i32_0, %c0_i32_1 : i32, i32, i32
  }
  func.func @transform_5(%arg0: i32) -> (i32, i32, i32) {
    %c0_i32 = arith.constant 0 : i32
    %c0_i32_0 = arith.constant 0 : i32
    %c0_i32_1 = arith.constant 0 : i32
    %c0_i32_2 = arith.constant 0 : i32
    return %c0_i32, %c0_i32_0, %c0_i32_1 : i32, i32, i32
  }
  func.func @transform_6(%arg0: i32) -> (i32, i32) {
    %c0_i32 = arith.constant 0 : i32
    %c0_i32_0 = arith.constant 0 : i32
    %c0_i32_1 = arith.constant 0 : i32
    return %c0_i32, %c0_i32_0 : i32, i32
  }
  func.func @transform_7(%arg0: i32) -> (i32, i32, i32) {
    %c0_i32 = arith.constant 0 : i32
    %c0_i32_0 = arith.constant 0 : i32
    %c0_i32_1 = arith.constant 0 : i32
    return %arg0, %c0_i32, %c0_i32_0 : i32, i32, i32
  }
}

</mosaic_0001>

<bundles_post_ra>
// kernel: tpu_custom_call.1
= control target key start
LH: loop header
LB: loop body
LE: loop exit
PB: predicated region body
PF: predicated region fallthrough
CT: control target
= control target key end

     0   :  { %12 = vsyncpa [#allocation4], 0  ;;  %s5362_s0 = inlined_call_operand.vmem [shape: f32[2,8,256], index: 0, kind: input, shape index: {}]   ;;  %s5363_s1 = inlined_call_operand.vmem [shape: f32[9,8,8], index: 1, kind: input, shape index: {}]   ;;  %s5364_s2 = inlined_call_operand.vmem [shape: f32[9,8,16], index: 2, kind: input, shape index: {}]   ;;  %s5365_s3 = inlined_call_operand.vmem [shape: f32[9,8,24], index: 3, kind: input, shape index: {}]   ;;  %s5366_s4 = inlined_call_operand.hbm [shape: f32[9,8,32], index: 4, kind: input, shape index: {}]   ;;  %s5367_s5 = inlined_call_operand.vmem [shape: f32[4,8,4], index: 5, kind: input, shape index: {}]   ;;  %s5368_s6 = inlined_call_operand.vmem [shape: f32[2,256], index: 6, kind: input, shape index: {}]   ;;  %s5369_s7 = inlined_call_operand.hbm [shape: f32[2,8,256], index: 7, kind: output, shape index: {}]  }
   0x1   :  { %13 = vsyncpa [#allocation5], 0 }
   0x2   :  { %15 = vsyncpa [#allocation5 + $0x1], 0  ;;  %s4349_s24 = smov 0   ;;  %s4351_s25 = smov 0  }
   0x3   :  { %s4353_s26 = smov 0   ;;  %s4355_s27 = smov 0  }
   0x4 LB: > { %s4370_s28 = sadd.s32 4294967295, %s4281_s27   ;;  %s4004_s29 = sadd.s32 4294967294, %s4281_s27   ;;  %s4281_s27 = sphi %s4355_s27, %s5377_s27   ;;  %s4277_s26 = sphi %s4353_s26, %s5376_s26   ;;  %s4273_s25 = sphi %s4351_s25, %s5375_s25   ;;  %s4269_s24 = sphi %s4349_s24, %s5374_s24  }
   0x5   : > { %s4374_s30 = sadd.s32 1, %s4281_s27   ;;  %s180_s8 = sadd.s32 1, %s4277_s26 }
   0x6   : > { %s177_s9 = ssub.s32 %s4281_s27, %s4374_s30  ;;  %p190_p0 = scmp.ne.s32.totalorder %s4277_s26, %s4273_s25 }
   0x7   : > { %p178_p1 = scmp.eq.s32.totalorder %s177_s9, 0  ;;  %p191_p2 = scmp.eq.s32.totalorder %s4370_s28, 1 }
   0x8   : > { %p196_p3 = scmp.ne.s32.totalorder %s4273_s25, %s4269_s24  ;;  %p197_p4 = scmp.eq.s32.totalorder %s4004_s29, 1 }
   0x9   : > { %s4385_s10 = scalar_select %p178_p1, %s4277_s26, %s180_s8  }
   0xa   : > { %p4387_p5 = por %p191_p2, %p190_p0  ;;  %p4391_p6 = por %p197_p4, %p196_p3 }
   0xb   : > { %p4005_p7 = scmp.ge.s32.totalorder %s4281_s27, 1  ;;  %p204_p8 = scmp.lt.s32.totalorder %s4281_s27, 3 }
   0xc   : > { %s5371_s12 = scalar_select %p4391_p6, 1, 0 }
   0xd   : > { %p4104_p9 = scmp.eq.s32.totalorder %s4370_s28, 0  ;;  %p4398_p10 = pnand %p4005_p7, %p204_p8 }
   0xe   : > { %s4283_s14 = smov [#allocation3]  }
   0xf   : > { %s225_s15 = sshll.u32 %s4283_s14, 4  ;;  %p4096_p11 = pneg %p4398_p10  ;;  %s226_s15 = int_to_ptr.vmem [resolvable:$true] %s225_s15 }
  0x10   : > { %s4202_s16 = scalar_lea.vmem %s226_s15, 1152  ;;  %p4210_p3 = scmp.lt.s32.totalorder %s226_s15, %s226_s15 }
  0x11   : > { %p4097_p12 = pnand %p4104_p9, %p4096_p11  ;;  %p4203_p0 = scmp.ne.s32.totalorder %s226_s15, %s4202_s16 }
  0x12   : > { %p4211_p4 = scmp.lt.s32.totalorder %s4202_s16, %s4202_s16 }
  0x13   : > { %p4193_p13 = pneg %p4097_p12 }
  0x14   : > { %p4212_p6 = por %p4211_p4, %p4210_p3 }
  0x15   : > { %p4205_p1 = pnand %p4203_p0, %p4193_p13 }
  0x17   : > { %p4206_p2 = pneg %p4205_p1 }
  0x19   : > { %p4213_p7 = pnand %p4212_p6, %p4206_p2 }
  0x1b   : > { %4216 = shalt.err (!%p4213_p7)
}
  0x1c   : > { %s4284_s17 = smov 128   ;;  %s4285_s18 = smov 8  }
  0x1d   : > { %4099 = dma.hbm_to_vmem [thread:$0]  (!%p4097_p12), %s5366_s4, 1152, %s226_s15, [#allocation4], %s4284_s17, %s4284_s17, %s4285_s18  }
  0x1e   : > { %255 = sbr.rel (%p4398_p10) target bundleno = 3209 (0xc89), region = 48 }
  0x23   : > { %4260 = dma.done.wait (%p4104_p9), [#allocation4], 1152  }
  0x24   : > { %4262 = vsyncadd (%p4104_p9), [#allocation4], 4294966144  ;;  %p287_p8 = scmp.lt.s32.totalorder %s4370_s28, 1  ;;  %v4286_v0 = vmov 0.0   ;;  %s4287_s9 = smov 16   ;;  %v4292_v3 = vmov 0   ;;  %v292_v5 = vlaneseq }
  0x25   : > { %422 = vmatprep.mubr.f32.mxu0 %v4286_v0  ;;  %517 = vmatprep.mubr.f32.mxu1 %v4286_v0  ;;  %s4288_s13 = smov 17   ;;  %s4289_s14 = smov 15   ;;  %v4454_v4 = vld [vmem:[%s5367_s5] sm:$0xff]  ;;  %vm354_vm2 = vcmask 64512   ;;  %v4017_v16 = vld [vmem:[%s5363_s1 + $0x8] sm:$0xff]  ;;  %v4019_v21 = vld [vmem:[%s5363_s1 + $0x10] sm:$0xff] }
  0x26   : > { %s288_s21 = scalar_select %p287_p8, %s4370_s28, 1  ;;  %4164 = vset.pattern.permute.xlu0 %v4292_v3  ;;  %v4458_v6 = vand.u32 127, %v292_v5  ;;  %v353_v15 = vld [vmem:[%s5363_s1] sm:$0xff]  ;;  %v4021_v26 = vld [vmem:[%s5363_s1 + $0x18] sm:$0xff]  ;;  %v4025_v32 = vld [vmem:[%s5363_s1 + $0x28] sm:$0xff]  ;;  %v318_v48 = vshrl.u32 %v292_v5, 7 }
  0x27   : > { %s4290_s15 = smov 1   ;;  %s4291_s16 = smov 127   ;;  %v4023_v27 = vld [vmem:[%s5363_s1 + $0x20] sm:$0xff]  ;;  %v4027_v37 = vld [vmem:[%s5363_s1 + $0x30] sm:$0xff]  ;;  %v4029_v42 = vld [vmem:[%s5363_s1 + $0x38] sm:$0xff] }
  0x28   : > { %s4088_s22 = sshll.u32 %s288_s21, 4  ;;  %s4293_s17 = smov 113   ;;  %vm350_vm0 = vcmp.lt.s32.totalorder %v4458_v6, 17  ;;  %vm445_vm1 = vcmp.lt.s32.totalorder %v4458_v6, 16  ;;  %vm532_vm3 = vcmp.lt.s32.totalorder %v4458_v6, 15  ;;  %vm627_vm4 = vcmp.lt.s32.totalorder %v4458_v6, 1 }
  0x29   : > { %s4422_s8 = scalar_lea.vmem %s5362_s0, %s4088_s22  ;;  %s4294_s18 = smov 112   ;;  %vm792_vm5 = vcmp.lt.s32.totalorder %v4458_v6, 127  ;;  %vm879_vm6 = vcmp.lt.s32.totalorder %v4458_v6, 113  ;;  %vm974_vm7 = vcmp.lt.s32.totalorder %v4458_v6, 112  ;;  %vm1061_vm8 = vcmp.lt.s32.totalorder %v4458_v6, 111  ;;  %v4031_v47 = vld [vmem:[%s5363_s1 + $0x40] sm:$0xff] }
  0x2a   : > { %v4425_v1 = vld [vmem:[%s4422_s8] sm:$0xff]  ;;  %v4430_v2 = vld [vmem:[%s4422_s8 + $0x8] sm:$0xff]  ;;  %s4295_s19 = smov 111   ;;  %v4524_v49 = vsub.s32 0, %v318_v48  ;;  %vm304_vm9 = vcmp.ge.s32.totalorder %v4458_v6, 16  ;;  %v323_v54 = vsub.s32 1, %v318_v48 }
  0x2b   : > { %441 = vrot.lane.b32.xlu1 %v4425_v1, %s4287_s9  ;;  %346 = vrot.lane.b32.xlu0 %v4425_v1, %s4288_s13  ;;  %v295_v50 = vld [vmem:[%s5368_s6] ss:$2 sm:$0x3]  ;;  %v4014_v52 = vsel %vm304_vm9, 1.0, %v4286_v0  ;;  %s4298_s22 = smov 31   ;;  %s4299_s23 = smov 97  }
  0x2c   : > { %v4531_v51 = vrot.slane %v295_v50, %v4524_v49  ;;  %v4013_v53 = vld [vmem:[%s5368_s6 + $0x1] ss:$2 sm:$0x3]  ;;  %v4541_v57 = vrot.slane %v295_v50, %v323_v54  ;;  %s4300_s29 = smov 96   ;;  %vm1232_vm13 = vcmp.lt.s32.totalorder %v4458_v6, 33  ;;  %vm1333_vm14 = vcmp.lt.s32.totalorder %v4458_v6, 32 }
  0x2d   : > { %v4539_v56 = vrot.slane %v4013_v53, %v4524_v49  ;;  %v4549_v61 = vrot.slane %v4013_v53, %v323_v54  ;;  %vm1426_vm15 = vcmp.lt.s32.totalorder %v4458_v6, 31  ;;  %vm2270_vm9 = vcmp.lt.s32.totalorder %v4458_v6, 64 }
  0x2e   : > { %v327_v55 = vmul.f32 %v4014_v52, %v4531_v51  ;;  %v4547_v60 = vrot.slane %v4541_v57, %v4524_v49 }
  0x2f   : > { %443 = vrot.lane.b32.xlu1 %v4430_v2, %s4287_s9  ;;  %348 = vrot.lane.b32.xlu0 %v4430_v2, %s4288_s13  ;;  %v340_v59 = vmul.f32 %v4014_v52, %v4539_v56  ;;  %v4577_v50 = vrot.slane %v4539_v56, %v4524_v49  ;;  %s4301_s9 = smov 95   ;;  %s4303_s13 = smov 33  }
  0x30   : > { %v432_v58 = vrot.slane %v327_v55, %v4524_v49 }
  0x33   : > { %530 = vrot.lane.b32.xlu1 %v4430_v2, %s4289_s14  ;;  %528 = vrot.lane.b32.xlu0 %v4425_v1, %s4289_s14  ;;  %s4304_s14 = smov 32  }
  0x37   : > { %625 = vrot.lane.b32.xlu1 %v4430_v2, %s4290_s15  ;;  %623 = vrot.lane.b32.xlu0 %v4425_v1, %s4290_s15 }
  0x3b   : > { %790 = vrot.lane.b32.xlu1 %v4430_v2, %s4291_s16  ;;  %788 = vrot.lane.b32.xlu0 %v4425_v1, %s4291_s16 }
  0x3f   : > { %877 = vrot.lane.b32.xlu1 %v4430_v2, %s4293_s17  ;;  %875 = vrot.lane.b32.xlu0 %v4425_v1, %s4293_s17  ;;  %s4307_s17 = smov 63  }
  0x43   : > { %972 = vrot.lane.b32.xlu1 %v4430_v2, %s4294_s18  ;;  %970 = vrot.lane.b32.xlu0 %v4425_v1, %s4294_s18 }
  0x47   : > { %1059 = vrot.lane.b32.xlu1 %v4430_v2, %s4295_s19  ;;  %1057 = vrot.lane.b32.xlu0 %v4425_v1, %s4295_s19 }
  0x4b   : > { %1155 = vperm.xlu0 %4164, %v4454_v4  }
  0x9d   : > { %v442_v7 = vpop.permute.xlu1 %441  ;;  %v347_v8 = vpop.permute.xlu0 %346 }
  0xa1   : > { %v444_v9 = vpop.permute.xlu1 %443  ;;  %v349_v10 = vpop.permute.xlu0 %348 }
  0xa2   : > { %v351_v11 = vsel %vm350_vm0, %v347_v8, %v349_v10  ;;  %v446_v12 = vsel %vm445_vm1, %v442_v7, %v444_v9  ;;  %v352_v13 = vsel %vm350_vm0, %v349_v10, %v347_v8  ;;  %v447_v14 = vsel %vm445_vm1, %v444_v9, %v442_v7 }
  0xa3   : > { %388 = vmatprep.subr.mxu0 %v351_v11  ;;  %483 = vmatprep.subr.mxu1 %v446_v12  ;;  %v614_v8 = vrot.slane %v340_v59, %v4524_v49  ;;  %v4553_v10 = vadd.s32 128, %v4458_v6  ;;  %vm1238_vm0 = vcmask 130048   ;;  %vm1789_vm1 = vcmp.lt.s32.totalorder %v4458_v6, 97 }
  0xa4   : > { %389 = vmatpush1.msra.mxu0 %v352_v13  ;;  %484 = vmatpush1.msra.mxu1 %v447_v14  ;;  %v4558_v13 = vrot.slane %v4549_v61, %v4524_v49 }
  0xa5   : > { %v531_v17 = vpop.permute.xlu1 %530  ;;  %v529_v18 = vpop.permute.xlu0 %528  ;;  %4016 = vmatmul.mubr.msk.f32.vlgmr.msra.gmra.mxu0 %vm354_vm2, %v353_v15  ;;  %4018 = vmatmul.mubr.msk.f32.vlgmr.msra.gmra.mxu1 %vm354_vm2, %v4017_v16  ;;  %vm311_vm10 = vcmp.lt.s32.totalorder %v4553_v10, 240 }
  0xa6   : > { %v534_v19 = vsel %vm532_vm3, %v531_v17, %v529_v18  ;;  %v533_v20 = vsel %vm532_vm3, %v529_v18, %v531_v17  ;;  %604 = vmatprep.mubr.f32.mxu0 %v4286_v0  ;;  %699 = vmatprep.mubr.f32.mxu1 %v4286_v0  ;;  %vm1983_vm3 = vcmp.lt.s32.totalorder %v4458_v6, 95 }
  0xa7   : > { %570 = vmatprep.subr.mxu0 %v533_v20 }
  0xa8   : > { %571 = vmatpush1.msra.mxu0 %v534_v19 }
  0xa9   : > { %v626_v22 = vpop.permute.xlu1 %625  ;;  %v624_v23 = vpop.permute.xlu0 %623  ;;  %4020 = vmatmul.mubr.msk.f32.vlgmr.msra.gmra.mxu0 %vm354_vm2, %v4019_v21  ;;  %745 = vmatprep.subr.mxu0 %v4430_v2 }
  0xaa   : > { %v629_v24 = vsel %vm627_vm4, %v626_v22, %v624_v23  ;;  %v628_v25 = vsel %vm627_vm4, %v624_v23, %v626_v22  ;;  %746 = vmatpush1.msra.mxu0 %v4425_v1  ;;  %779 = vmatprep.mubr.f32.mxu0 %v4286_v0 }
  0xab   : > { %665 = vmatprep.subr.mxu1 %v628_v25  ;;  %v4015_v25 = vsel %vm311_vm10, 1.0, %v4286_v0 }
  0xac   : > { %666 = vmatpush1.msra.mxu1 %v629_v24 }
  0xad   : > { %v791_v28 = vpop.permute.xlu1 %790  ;;  %v789_v29 = vpop.permute.xlu0 %788  ;;  %4022 = vmatmul.mubr.msk.f32.vlgmr.msra.gmra.mxu1 %vm354_vm2, %v4021_v26  ;;  %4024 = vmatmul.mubr.msk.f32.vlgmr.msra.gmra.mxu0 %vm354_vm2, %v4023_v27 }
  0xae   : > { %v793_v30 = vsel %vm792_vm5, %v789_v29, %v791_v28  ;;  %v794_v31 = vsel %vm792_vm5, %v791_v28, %v789_v29  ;;  %864 = vmatprep.mubr.f32.mxu1 %v4286_v0  ;;  %951 = vmatprep.mubr.f32.mxu0 %v4286_v0 }
  0xaf   : > { %830 = vmatprep.subr.mxu1 %v794_v31  ;;  %v343_v31 = vmul.f32 %v4015_v25, %v4541_v57 }
  0xb0   : > { %831 = vmatpush1.msra.mxu1 %v793_v30 }
  0xb1   : > { %v878_v33 = vpop.permute.xlu1 %877  ;;  %v876_v34 = vpop.permute.xlu0 %875  ;;  %4026 = vmatmul.mubr.msk.f32.vlgmr.msra.gmra.mxu1 %vm354_vm2, %v4025_v32 }
  0xb2   : > { %v880_v35 = vsel %vm879_vm6, %v876_v34, %v878_v33  ;;  %v881_v36 = vsel %vm879_vm6, %v878_v33, %v876_v34  ;;  %1046 = vmatprep.mubr.f32.mxu1 %v4286_v0  ;;  %vm1204_vm6 = vcmp.ge.s32.totalorder %v4458_v6, 32 }
  0xb3   : > { %917 = vmatprep.subr.mxu0 %v881_v36 }
  0xb4   : > { %918 = vmatpush1.msra.mxu0 %v880_v35  ;;  %v4569_v35 = vrot.slane %v4531_v51, %v4524_v49 }
  0xb5   : > { %v973_v38 = vpop.permute.xlu1 %972  ;;  %v971_v39 = vpop.permute.xlu0 %970  ;;  %4028 = vmatmul.mubr.msk.f32.vlgmr.msra.gmra.mxu0 %vm354_vm2, %v4027_v37 }
  0xb6   : > { %v975_v40 = vsel %vm974_vm7, %v971_v39, %v973_v38  ;;  %v976_v41 = vsel %vm974_vm7, %v973_v38, %v971_v39  ;;  %1133 = vmatprep.mubr.f32.mxu0 %v4286_v0  ;;  %v965_v38 = vrot.slane %v343_v31, %v4524_v49  ;;  %vm1211_vm7 = vcmp.lt.s32.totalorder %v4553_v10, 224 }
  0xb7   : > { %1012 = vmatprep.subr.mxu1 %v976_v41 }
  0xb8   : > { %1013 = vmatpush1.msra.mxu1 %v975_v40 }
  0xb9   : > { %v1060_v43 = vpop.permute.xlu1 %1059  ;;  %4030 = vmatmul.mubr.msk.f32.vlgmr.msra.gmra.mxu1 %vm354_vm2, %v4029_v42  ;;  %v1058_v44 = vpop.permute.xlu0 %1057 }
  0xba   : > { %v1062_v45 = vsel %vm1061_vm8, %v1058_v44, %v1060_v43  ;;  %v1063_v46 = vsel %vm1061_vm8, %v1060_v43, %v1058_v44  ;;  %1306 = vmatprep.mubr.f32.mxu1 %v4286_v0  ;;  %v345_v44 = vmul.f32 %v4015_v25, %v4549_v61  ;;  %vm2163_vm8 = vcmp.lt.s32.totalorder %v4458_v6, 65 }
  0xbb   : > { %1099 = vmatprep.subr.mxu0 %v1063_v46 }
  0xbc   : > { %1100 = vmatpush1.msra.mxu0 %v1062_v45  ;;  %v1147_v54 = vrot.slane %v345_v44, %v4524_v49 }
  0xbd   : > { %4032 = vmatmul.mubr.msk.f32.vlgmr.msra.gmra.mxu0 %vm354_vm2, %v4031_v47  ;;  %vm1890_vm2 = vcmp.lt.s32.totalorder %v4458_v6, 96 }
  0xbe   : > { %1407 = vmatprep.mubr.f32.mxu0 %v4286_v0 }
 0x165   : > { %v424_v62 = vpop.f32.mrf.mxu0  ;;  %v519_v63 = vpop.f32.mrf.mxu1 }
 0x166   : > { %v437_v5 = vmul.f32 %v432_v58, %v424_v62  ;;  %v524_v7 = vmul.f32 %v4014_v52, %v519_v63 }
 0x167   : > { %v426_v9 = vpop.f32.mrf.mxu0  ;;  %v521_v14 = vpop.f32.mrf.mxu1 }
 0x168   : > { %v438_v11 = vmul.f32 %v4547_v60, %v426_v9  ;;  %v526_v12 = vadd.f32 %v524_v7, %v437_v5  ;;  %v1156_v9 = vpop.permute.xlu0 %1155 }
 0x169   : > { %v606_v15 = vpop.f32.mrf.mxu0 }
 0x16a   : > { %v527_v16 = vadd.f32 %v521_v14, %v438_v11  ;;  %v619_v17 = vmul.f32 %v614_v8, %v606_v15 }
 0x16b   : > { %v608_v18 = vpop.f32.mrf.mxu0 }
 0x16c   : > { %v621_v19 = vadd.f32 %v619_v17, %v526_v12  ;;  %v620_v20 = vmul.f32 %v4558_v13, %v608_v18 }
 0x16d   : > { %v701_v21 = vpop.f32.mrf.mxu1  ;;  %v781_v22 = vpop.f32.mrf.mxu0 }
 0x16e   : > { %v622_v23 = vadd.f32 %v620_v20, %v527_v16  ;;  %v706_v24 = vmul.f32 %v701_v21, %v4531_v51 }
 0x16f   : > { %v703_v26 = vpop.f32.mrf.mxu1  ;;  %v783_v29 = vpop.f32.mrf.mxu0 }
 0x170   : > { %v707_v27 = vmul.f32 %v703_v26, %v4541_v57  ;;  %v708_v28 = vadd.f32 %v706_v24, %v621_v19  ;;  %v4297_v24 = vmov 2  }
 0x171   : > { %v866_v30 = vpop.f32.mrf.mxu1  ;;  %4165 = vset.pattern.permute.xlu0 %v4297_v24 }
 0x172   : > { %v786_v32 = vadd.f32 %v781_v22, %v708_v28  ;;  %v709_v33 = vadd.f32 %v707_v27, %v622_v23  ;;  %v871_v34 = vmul.f32 %v866_v30, %v4539_v56  ;;  %v4296_v23 = vmov 1  }
 0x173   : > { %v868_v36 = vpop.f32.mrf.mxu1  ;;  %4166 = vset.pattern.permute.xlu1 %v4296_v23  ;;  %v4302_v30 = vmov 3  }
 0x174   : > { %v787_v39 = vadd.f32 %v783_v29, %v709_v33  ;;  %v873_v40 = vadd.f32 %v871_v34, %v786_v32  ;;  %v872_v41 = vmul.f32 %v868_v36, %v4549_v61 }
 0x175   : > { %v953_v37 = vpop.f32.mrf.mxu0 }
 0x176   : > { %v966_v42 = vmul.f32 %v4569_v35, %v953_v37  ;;  %v874_v46 = vadd.f32 %v872_v41, %v787_v39 }
 0x177   : > { %v955_v43 = vpop.f32.mrf.mxu0 }
 0x178   : > { %v967_v47 = vmul.f32 %v965_v38, %v955_v43  ;;  %v968_v48 = vadd.f32 %v966_v42, %v873_v40 }
 0x179   : > { %v1048_v45 = vpop.f32.mrf.mxu1 }
 0x17a   : > { %v969_v58 = vadd.f32 %v967_v47, %v874_v46  ;;  %v1055_v59 = vadd.f32 %v1048_v45, %v968_v48 }
 0x17b   : > { %v1050_v52 = vpop.f32.mrf.mxu1 }
 0x17c   : > { %v1054_v53 = vmul.f32 %v4015_v25, %v1050_v52 }
 0x17d   : > { %v1135_v55 = vpop.f32.mrf.mxu0 }
 0x17e   : > { %v1148_v62 = vmul.f32 %v4577_v50, %v1135_v55  ;;  %v1056_v5 = vadd.f32 %v1054_v53, %v969_v58  ;;  %v4670_v53 = vld [vmem:[%s5367_s5 + $0x8] sm:$0xff] }
 0x17f   : > { %v1137_v63 = vpop.f32.mrf.mxu0 }
 0x180   : > { %v1150_v7 = vadd.f32 %v1148_v62, %v1055_v59  ;;  %v1149_v8 = vmul.f32 %v1147_v54, %v1137_v63 }
 0x182   : > { %v1151_v11 = vadd.f32 %v1149_v8, %v1056_v5  ;;  %v1158_v12 = vadd.f32 %v1156_v9, %v1150_v7 }
 0x184   : > { %v1159_v14 = vadd.f32 %v1156_v9, %v1151_v11 }
 0x186   : > { %v1160_v15 = vadd.f32 %v1159_v14, %v1158_v12 }
 0x188   : > { %1161 = vadd.xlane.f32.xlu1 %v1160_v15 }
 0x211   : > { %v1162_v16 = vpop.xlane.xlu1 %1161 }
 0x212   : > { %v1163_v17 = vmul.f32 0.00390625, %v1162_v16 }
 0x214   : > { %v1164_v18 = vsub.f32 %v1158_v12, %v1163_v17  ;;  %v1165_v19 = vsub.f32 %v1159_v14, %v1163_v17 }
 0x216   : > { %v1166_v20 = vmul.f32 %v1164_v18, %v1164_v18  ;;  %v1167_v21 = vmul.f32 %v1165_v19, %v1165_v19 }
 0x218   : > { %v1168_v22 = vadd.f32 %v1167_v21, %v1166_v20  ;;  %v1237_v20 = vld [vmem:[%s5364_s2] sm:$0xff] }
 0x21a   : > { %1169 = vadd.xlane.f32.xlu0 %v1168_v22 }
 0x230   : > { %1183 = vperm.xlu0 %4165, %v4454_v4  }
 0x234   : > { %4169 = vset.pattern.permute.xlu0 %v4296_v23 }
 0x235   : > { %1424 = vrot.lane.b32.xlu0 %v4430_v2, %s4298_s22 }
 0x239   : > { %1525 = vrot.lane.b32.xlu0 %v4430_v2, %s4290_s15 }
 0x23d   : > { %1695 = vrot.lane.b32.xlu0 %v4430_v2, %s4291_s16 }
 0x241   : > { %1787 = vrot.lane.b32.xlu0 %v4430_v2, %s4299_s23 }
 0x245   : > { %1888 = vrot.lane.b32.xlu0 %v4430_v2, %s4300_s29 }
 0x249   : > { %1981 = vrot.lane.b32.xlu0 %v4430_v2, %s4301_s9 }
 0x2a3   : > { %v1170_v25 = vpop.xlane.xlu0 %1169 }
 0x2a4   : > { %v1171_v26 = vmul.f32 0.00390625, %v1170_v25 }
 0x2a6   : > { %v1172_v27 = vadd.f32 1e-05, %v1171_v26 }
 0x2a8   : > { %4181 = vrsqrt.f32 %v1172_v27 }
 0x2ab   : > { %v1184_v31 = vpop.permute.xlu0 %1183 }
 0x2af   : > { %v1425_v55 = vpop.permute.xlu0 %1424 }
 0x2b3   : > { %v1526_v59 = vpop.permute.xlu0 %1525 }
 0x2b5   : > { %v4182_v28 = vpop.eup %4181 }
 0x2b6   : > { %v1174_v29 = vmul.f32 %v4182_v28, %v4454_v4 }
 0x2b7   : > { %v1696_v63 = vpop.permute.xlu0 %1695 }
 0x2b8   : > { %1177 = vperm.xlu1 %4166, %v1174_v29   ;;  %v4036_v29 = vld [vmem:[%s5364_s2 + $0x8] sm:$0xff] }
 0x2bb   : > { %v4676_v7 = vpop.permute.xlu0 %1787 }
 0x2bc   : > { %4167 = vset.pattern.permute.xlu1 %v4302_v30 }
 0x2bd   : > { %1191 = vperm.xlu1 %4167, %v4454_v4  }
 0x2bf   : > { %v4680_v9 = vpop.permute.xlu0 %1888 }
 0x2c1   : > { %1226 = vrot.lane.b32.xlu1 %v4425_v1, %s4303_s13 }
 0x2c2   : > { %4168 = vset.pattern.permute.xlu1 %v4292_v3 }
 0x2c3   : > { %v4684_v12 = vpop.permute.xlu0 %1981 }
 0x2c5   : > { %1230 = vrot.lane.b32.xlu1 %v4430_v2, %s4303_s13 }
 0x2c9   : > { %1327 = vrot.lane.b32.xlu1 %v4425_v1, %s4304_s14 }
 0x2cd   : > { %1331 = vrot.lane.b32.xlu1 %v4430_v2, %s4304_s14 }
 0x2d1   : > { %1420 = vrot.lane.b32.xlu1 %v4425_v1, %s4298_s22 }
 0x2d5   : > { %1521 = vrot.lane.b32.xlu1 %v4425_v1, %s4290_s15 }
 0x2d9   : > { %1691 = vrot.lane.b32.xlu1 %v4425_v1, %s4291_s16 }
 0x2dd   : > { %1783 = vrot.lane.b32.xlu1 %v4425_v1, %s4299_s23 }
 0x2e1   : > { %1884 = vrot.lane.b32.xlu1 %v4425_v1, %s4300_s29 }
 0x2e5   : > { %1977 = vrot.lane.b32.xlu1 %v4425_v1, %s4301_s9 }
 0x333   : > { %v1178_v4 = vpop.permute.xlu1 %1177 }
 0x334   : > { %v1180_v32 = vmul.f32 %v1178_v4, %v1164_v18  ;;  %v1181_v33 = vmul.f32 %v1178_v4, %v1165_v19 }
 0x336   : > { %v1186_v34 = vadd.f32 %v1184_v31, %v1180_v32  ;;  %v1187_v36 = vadd.f32 %v1184_v31, %v1181_v33 }
 0x338   : > { %v1192_v37 = vpop.permute.xlu1 %1191  ;;  %vm1188_vm11 = vcmp.ge.f32.partialorder %v1186_v34, 0.0  ;;  %vm1189_vm12 = vcmp.ge.f32.partialorder %v1187_v36, 0.0 }
 0x339   : > { %v1194_v38 = vmul.f32 %v1192_v37, %v1186_v34  ;;  %v1195_v39 = vmul.f32 %v1192_v37, %v1187_v36 }
 0x33b   : > { %v4621_v40 = vsel %vm1188_vm11, %v1186_v34, %v1194_v38  ;;  %v4623_v41 = vsel %vm1189_vm12, %v1187_v36, %v1195_v39  ;;  %v4038_v36 = vld [vmem:[%s5364_s2 + $0x10] sm:$0xff]  ;;  %vm2171_vm12 = vcmask 195584  }
 0x33c   : > { %1329 = vrot.lane.b32.xlu0 %v4623_v41, %s4304_s14  ;;  %1224 = vrot.lane.b32.xlu1 %v4621_v40, %s4303_s13  ;;  %v1227_v42 = vpop.permute.xlu1 %1226 }
 0x340   : > { %1422 = vrot.lane.b32.xlu0 %v4623_v41, %s4298_s22  ;;  %1228 = vrot.lane.b32.xlu1 %v4623_v41, %s4303_s13  ;;  %v1231_v43 = vpop.permute.xlu1 %1230  ;;  %s4305_s13 = smov 65  }
 0x341   : > { %v1234_v44 = vsel %vm1232_vm13, %v1227_v42, %v1231_v43  ;;  %v1236_v45 = vsel %vm1232_vm13, %v1231_v43, %v1227_v42  ;;  %v4040_v43 = vld [vmem:[%s5364_s2 + $0x18] sm:$0xff] }
 0x342   : > { %1270 = vmatprep.subr.mxu1 %v1234_v44  ;;  %v4042_v44 = vld [vmem:[%s5364_s2 + $0x20] sm:$0xff] }
 0x343   : > { %1271 = vmatpush1.msra.mxu1 %v1236_v45 }
 0x344   : > { %1523 = vrot.lane.b32.xlu0 %v4623_v41, %s4290_s15  ;;  %1325 = vrot.lane.b32.xlu1 %v4621_v40, %s4304_s14  ;;  %v1328_v46 = vpop.permute.xlu1 %1327  ;;  %s4306_s14 = smov 64  }
 0x348   : > { %1693 = vrot.lane.b32.xlu0 %v4623_v41, %s4291_s16  ;;  %1418 = vrot.lane.b32.xlu1 %v4621_v40, %s4298_s22  ;;  %v1332_v47 = vpop.permute.xlu1 %1331 }
 0x349   : > { %v1335_v48 = vsel %vm1333_vm14, %v1328_v46, %v1332_v47  ;;  %v1337_v52 = vsel %vm1333_vm14, %v1332_v47, %v1328_v46 }
 0x34a   : > { %1371 = vmatprep.subr.mxu0 %v1335_v48 }
 0x34b   : > { %1372 = vmatpush1.msra.mxu0 %v1337_v52 }
 0x34c   : > { %1785 = vrot.lane.b32.xlu0 %v4623_v41, %s4299_s23  ;;  %1519 = vrot.lane.b32.xlu1 %v4621_v40, %s4290_s15  ;;  %v1421_v54 = vpop.permute.xlu1 %1420 }
 0x34d   : > { %v1428_v21 = vsel %vm1426_vm15, %v1421_v54, %v1425_v55  ;;  %v1430_v22 = vsel %vm1426_vm15, %v1425_v55, %v1421_v54 }
 0x350   : > { %1886 = vrot.lane.b32.xlu0 %v4623_v41, %s4300_s29  ;;  %1689 = vrot.lane.b32.xlu1 %v4621_v40, %s4291_s16  ;;  %v1522_v58 = vpop.permute.xlu1 %1521 }
 0x351   : > { %v1528_v4 = vsel %vm627_vm4, %v1522_v58, %v1526_v59  ;;  %v1530_v31 = vsel %vm627_vm4, %v1526_v59, %v1522_v58  ;;  %v4044_v59 = vld [vmem:[%s5364_s2 + $0x28] sm:$0xff] }
 0x354   : > { %1979 = vrot.lane.b32.xlu0 %v4623_v41, %s4301_s9  ;;  %1781 = vrot.lane.b32.xlu1 %v4621_v40, %s4299_s23  ;;  %v1692_v62 = vpop.permute.xlu1 %1691  ;;  %s4308_s23 = smov [#allocation6]  }
 0x355   : > { %v1700_v45 = vsel %vm792_vm5, %v1696_v63, %v1692_v62  ;;  %v1698_v47 = vsel %vm792_vm5, %v1692_v62, %v1696_v63 }
 0x358   : > { %1882 = vrot.lane.b32.xlu1 %v4621_v40, %s4300_s29  ;;  %v4674_v5 = vpop.permute.xlu1 %1783  ;;  %s4221_s29 = sshll.u32 %s4308_s23, 4  ;;  %s4222_s29 = int_to_ptr.vmem [resolvable:$false] %s4221_s29 }
 0x359   : > { %v1793_v46 = vsel %vm1789_vm1, %v4676_v7, %v4674_v5  ;;  %v1791_v54 = vsel %vm1789_vm1, %v4674_v5, %v4676_v7 }
 0x35c   : > { %1975 = vrot.lane.b32.xlu1 %v4621_v40, %s4301_s9  ;;  %v4678_v8 = vpop.permute.xlu1 %1884  ;;  %s4223_s9 = scalar_lea.vmem %s4222_s29, 512 }
 0x35d   : > { %v1894_v63 = vsel %vm1890_vm2, %v4680_v9, %v4678_v8  ;;  %v1892_v5 = vsel %vm1890_vm2, %v4678_v8, %v4680_v9 }
 0x360   : > { %2080 = vperm.xlu1 %4168, %v4670_v53   ;;  %v4682_v11 = vpop.permute.xlu1 %1977 }
 0x361   : > { %v1987_v8 = vsel %vm1983_vm3, %v4684_v12, %v4682_v11  ;;  %v1985_v9 = vsel %vm1983_vm3, %v4682_v11, %v4684_v12 }
 0x364   : > { %4170 = vset.pattern.permute.xlu1 %v4297_v24 }
 0x3ae   : > { %v1225_v14 = vpop.permute.xlu1 %1224  ;;  %v1330_v15 = vpop.permute.xlu0 %1329 }
 0x3b2   : > { %v1229_v16 = vpop.permute.xlu1 %1228  ;;  %v1423_v17 = vpop.permute.xlu0 %1422 }
 0x3b3   : > { %v1235_v18 = vsel %vm1232_vm13, %v1229_v16, %v1225_v14  ;;  %v1233_v19 = vsel %vm1232_vm13, %v1225_v14, %v1229_v16  ;;  %vm2369_vm13 = vcmp.lt.s32.totalorder %v4458_v6, 63 }
 0x3b4   : > { %1272 = vmatprep.subr.mxu1 %v1233_v19 }
 0x3b5   : > { %1273 = vmatpush1.msra.mxu1 %v1235_v18 }
 0x3b6   : > { %v1326_v25 = vpop.permute.xlu1 %1325  ;;  %1464 = vmatprep.subr.mxu1 %v1428_v21  ;;  %v1524_v26 = vpop.permute.xlu0 %1523  ;;  %4035 = vmatmul.mubr.msk.f32.vlgmr.msra.gmra.mxu1 %vm1238_vm0, %v1237_v20  ;;  %v4048_v20 = vld [vmem:[%s5364_s2 + $0x38] sm:$0xff] }
 0x3b7   : > { %v1336_v27 = vsel %vm1333_vm14, %v1330_v15, %v1326_v25  ;;  %1465 = vmatpush1.msra.mxu1 %v1430_v22  ;;  %v1334_v28 = vsel %vm1333_vm14, %v1326_v25, %v1330_v15  ;;  %1500 = vmatprep.mubr.f32.mxu1 %v4286_v0  ;;  %v4046_v15 = vld [vmem:[%s5364_s2 + $0x30] sm:$0xff]  ;;  %v4050_v25 = vld [vmem:[%s5364_s2 + $0x40] sm:$0xff]  ;;  %vm2131_vm14 = vcmp.ge.s32.totalorder %v4458_v6, 64 }
 0x3b8   : > { %1373 = vmatprep.subr.mxu0 %v1334_v28  ;;  %v3456_v6 = vld [vmem:[#allocation3 + $0x20] sm:$0xff] }
 0x3b9   : > { %1374 = vmatpush1.msra.mxu0 %v1336_v27 }
 0x3ba   : > { %v1419_v32 = vpop.permute.xlu1 %1418  ;;  %1564 = vmatprep.subr.mxu0 %v1528_v4  ;;  %4037 = vmatmul.mubr.msk.f32.vlgmr.msra.gmra.mxu0 %vm1238_vm0, %v4036_v29  ;;  %v1694_v37 = vpop.permute.xlu0 %1693 }
 0x3bb   : > { %v1429_v33 = vsel %vm1426_vm15, %v1423_v17, %v1419_v32  ;;  %1565 = vmatpush1.msra.mxu0 %v1530_v31  ;;  %v1427_v34 = vsel %vm1426_vm15, %v1419_v32, %v1423_v17  ;;  %1600 = vmatprep.mubr.f32.mxu0 %v4286_v0  ;;  %vm2138_vm15 = vcmp.lt.s32.totalorder %v4553_v10, 192 }
 0x3bc   : > { %1466 = vmatprep.subr.mxu1 %v1427_v34 }
 0x3bd   : > { %1467 = vmatpush1.msra.mxu1 %v1429_v33 }
 0x3be   : > { %v1520_v38 = vpop.permute.xlu1 %1519  ;;  %1644 = vmatprep.subr.mxu1 %v4430_v2  ;;  %4039 = vmatmul.mubr.msk.f32.vlgmr.msra.gmra.mxu1 %vm1238_vm0, %v4038_v36  ;;  %v1786_v48 = vpop.permute.xlu0 %1785 }
 0x3bf   : > { %v1529_v39 = vsel %vm627_vm4, %v1524_v26, %v1520_v38  ;;  %1645 = vmatpush1.msra.mxu1 %v4425_v1  ;;  %v1527_v42 = vsel %vm627_vm4, %v1520_v38, %v1524_v26  ;;  %1680 = vmatprep.mubr.f32.mxu1 %v4286_v0  ;;  %v4033_v26 = vsel %vm1204_vm6, 1.0, %v4286_v0 }
 0x3c0   : > { %1566 = vmatprep.subr.mxu0 %v1527_v42  ;;  %1646 = vmatprep.subr.mxu1 %v4623_v41  ;;  %v1216_v27 = vmul.f32 %v4033_v26, %v4531_v51  ;;  %v1218_v4 = vmul.f32 %v4033_v26, %v4539_v56 }
 0x3c1   : > { %1567 = vmatpush1.msra.mxu0 %v1529_v39  ;;  %1647 = vmatpush1.msra.mxu1 %v4621_v40 }
 0x3c2   : > { %v1690_v52 = vpop.permute.xlu1 %1689  ;;  %1734 = vmatprep.subr.mxu0 %v1700_v45  ;;  %1827 = vmatprep.subr.mxu1 %v1793_v46  ;;  %v1887_v16 = vpop.permute.xlu0 %1886  ;;  %v1316_v29 = vrot.slane %v1216_v27, %v4524_v49  ;;  %v1510_v36 = vrot.slane %v1218_v4, %v4524_v49 }
 0x3c3   : > { %v1697_v55 = vsel %vm792_vm5, %v1690_v52, %v1694_v37  ;;  %4041 = vmatmul.mubr.msk.f32.vlgmr.msra.gmra.mxu0 %vm1238_vm0, %v4040_v43  ;;  %4043 = vmatmul.mubr.msk.f32.vlgmr.msra.gmra.mxu1 %vm1238_vm0, %v4042_v44  ;;  %v1699_v58 = vsel %vm792_vm5, %v1694_v37, %v1690_v52 }
 0x3c4   : > { %1735 = vmatpush1.msra.mxu0 %v1698_v47  ;;  %1828 = vmatpush1.msra.mxu1 %v1791_v54  ;;  %v4034_v54 = vsel %vm1211_vm7, 1.0, %v4286_v0 }
 0x3c5   : > { %1736 = vmatprep.subr.mxu0 %v1699_v58  ;;  %1770 = vmatprep.mubr.f32.mxu0 %v4286_v0 }
 0x3c6   : > { %1737 = vmatpush1.msra.mxu0 %v1697_v55  ;;  %v1782_v62 = vpop.permute.xlu1 %1781  ;;  %1863 = vmatprep.mubr.f32.mxu1 %v4286_v0  ;;  %v1980_v11 = vpop.permute.xlu0 %1979 }
 0x3c7   : > { %v1790_v7 = vsel %vm1789_vm1, %v1782_v62, %v1786_v48  ;;  %1928 = vmatprep.subr.mxu0 %v1894_v63  ;;  %4045 = vmatmul.mubr.msk.f32.vlgmr.msra.gmra.mxu0 %vm1238_vm0, %v4044_v59  ;;  %v1792_v14 = vsel %vm1789_vm1, %v1786_v48, %v1782_v62 }
 0x3c8   : > { %1929 = vmatpush1.msra.mxu0 %v1892_v5  ;;  %1829 = vmatprep.subr.mxu1 %v1792_v14 }
 0x3c9   : > { %1830 = vmatpush1.msra.mxu1 %v1790_v7  ;;  %1964 = vmatprep.mubr.f32.mxu0 %v4286_v0  ;;  %v1221_v7 = vmul.f32 %v4034_v54, %v4541_v57 }
 0x3ca   : > { %v1883_v17 = vpop.permute.xlu1 %1882  ;;  %2021 = vmatprep.subr.mxu1 %v1987_v8  ;;  %4047 = vmatmul.mubr.msk.f32.vlgmr.msra.gmra.mxu1 %vm1238_vm0, %v4046_v15 }
 0x3cb   : > { %v1891_v18 = vsel %vm1890_vm2, %v1883_v17, %v1887_v16  ;;  %2022 = vmatpush1.msra.mxu1 %v1985_v9  ;;  %v1893_v19 = vsel %vm1890_vm2, %v1887_v16, %v1883_v17  ;;  %2057 = vmatprep.mubr.f32.mxu1 %v4286_v0  ;;  %vm3096_vm2 = vcmask 261120  }
 0x3cc   : > { %1930 = vmatprep.subr.mxu0 %v1893_v19 }
 0x3cd   : > { %1931 = vmatpush1.msra.mxu0 %v1891_v18  ;;  %v1877_v18 = vrot.slane %v1221_v7, %v4524_v49 }
 0x3ce   : > { %v1976_v12 = vpop.permute.xlu1 %1975  ;;  %4049 = vmatmul.mubr.msk.f32.vlgmr.msra.gmra.mxu0 %vm1238_vm0, %v4048_v20 }
 0x3cf   : > { %v1984_v21 = vsel %vm1983_vm3, %v1976_v12, %v1980_v11  ;;  %v1986_v22 = vsel %vm1983_vm3, %v1980_v11, %v1976_v12  ;;  %2239 = vmatprep.mubr.f32.mxu0 %v4286_v0 }
 0x3d0   : > { %2023 = vmatprep.subr.mxu1 %v1986_v22  ;;  %v1223_v22 = vmul.f32 %v4034_v54, %v4549_v61 }
 0x3d1   : > { %2024 = vmatpush1.msra.mxu1 %v1984_v21 }
 0x3d2   : > { %4051 = vmatmul.mubr.msk.f32.vlgmr.msra.gmra.mxu1 %vm1238_vm0, %v4050_v25 }
 0x3d3   : > { %2346 = vmatprep.mubr.f32.mxu1 %v4286_v0 }
 0x476   : > { %v1308_v28 = vpop.f32.mrf.mxu1 }
 0x477   : > { %v1321_v31 = vmul.f32 %v1316_v29, %v1308_v28 }
 0x478   : > { %v1310_v32 = vpop.f32.mrf.mxu1 }
 0x479   : > { %v1322_v37 = vmul.f32 %v1310_v32, %v4547_v60 }
 0x47a   : > { %v1409_v33 = vpop.f32.mrf.mxu0 }
 0x47b   : > { %v1414_v34 = vmul.f32 %v4033_v26, %v1409_v33 }
 0x47c   : > { %v1411_v42 = vpop.f32.mrf.mxu0 }
 0x47d   : > { %v1416_v38 = vadd.f32 %v1414_v34, %v1321_v31  ;;  %v1417_v44 = vadd.f32 %v1411_v42, %v1322_v37  ;;  %v2071_v31 = vrot.slane %v1223_v22, %v4524_v49 }
 0x47e   : > { %v1502_v39 = vpop.f32.mrf.mxu1 }
 0x47f   : > { %v1515_v43 = vmul.f32 %v1510_v36, %v1502_v39 }
 0x480   : > { %v1504_v45 = vpop.f32.mrf.mxu1 }
 0x481   : > { %v1516_v46 = vmul.f32 %v1504_v45, %v4558_v13  ;;  %v1517_v47 = vadd.f32 %v1515_v43, %v1416_v38  ;;  %v2081_v43 = vpop.permute.xlu1 %2080 }
 0x483   : > { %v1602_v48 = vpop.f32.mrf.mxu0  ;;  %v1682_v52 = vpop.f32.mrf.mxu1  ;;  %v1518_v55 = vadd.f32 %v1516_v46, %v1417_v44 }
 0x484   : > { %v1607_v58 = vmul.f32 %v1602_v48, %v4531_v51 }
 0x485   : > { %v1604_v59 = vpop.f32.mrf.mxu0  ;;  %v1684_v5 = vpop.f32.mrf.mxu1 }
 0x486   : > { %v1608_v62 = vmul.f32 %v1604_v59, %v4541_v57  ;;  %v1609_v63 = vadd.f32 %v1607_v58, %v1517_v47 }
 0x487   : > { %v1772_v14 = vpop.f32.mrf.mxu0 }
 0x488   : > { %v1687_v15 = vadd.f32 %v1682_v52, %v1609_v63  ;;  %v1610_v16 = vadd.f32 %v1608_v62, %v1518_v55  ;;  %v1777_v8 = vmul.f32 %v1772_v14, %v4539_v56 }
 0x489   : > { %v1774_v9 = vpop.f32.mrf.mxu0 }
 0x48a   : > { %v1865_v17 = vpop.f32.mrf.mxu1  ;;  %v1688_v19 = vadd.f32 %v1684_v5, %v1610_v16  ;;  %v1779_v20 = vadd.f32 %v1777_v8, %v1687_v15  ;;  %v1778_v11 = vmul.f32 %v1774_v9, %v4549_v61 }
 0x48b   : > { %v1878_v12 = vmul.f32 %v1865_v17, %v4569_v35 }
 0x48c   : > { %v1867_v21 = vpop.f32.mrf.mxu1  ;;  %v1780_v26 = vadd.f32 %v1778_v11, %v1688_v19  ;;  %v4870_v11 = vld [vmem:[%s4422_s8] sm:$0xff] }
 0x48d   : > { %v1879_v27 = vmul.f32 %v1877_v18, %v1867_v21  ;;  %v1880_v28 = vadd.f32 %v1878_v12, %v1779_v20 }
 0x48e   : > { %v1966_v25 = vpop.f32.mrf.mxu0 }
 0x48f   : > { %v1881_v33 = vadd.f32 %v1879_v27, %v1780_v26  ;;  %v1973_v34 = vadd.f32 %v1966_v25, %v1880_v28 }
 0x490   : > { %v1968_v29 = vpop.f32.mrf.mxu0 }
 0x491   : > { %v1972_v4 = vmul.f32 %v4034_v54, %v1968_v29 }
 0x492   : > { %v2059_v32 = vpop.f32.mrf.mxu1 }
 0x493   : > { %v2072_v36 = vmul.f32 %v2059_v32, %v4577_v50  ;;  %v1974_v38 = vadd.f32 %v1972_v4, %v1881_v33 }
 0x494   : > { %v2061_v37 = vpop.f32.mrf.mxu1 }
 0x495   : > { %v2074_v39 = vadd.f32 %v2072_v36, %v1973_v34  ;;  %v2073_v42 = vmul.f32 %v2071_v31, %v2061_v37 }
 0x497   : > { %v2075_v44 = vadd.f32 %v2073_v42, %v1974_v38  ;;  %v2083_v45 = vadd.f32 %v2081_v43, %v2074_v39  ;;  %v4945_v42 = vld [vmem:[%s5367_s5 + $0x10] sm:$0xff] }
 0x499   : > { %v2084_v46 = vadd.f32 %v2081_v43, %v2075_v44 }
 0x49b   : > { %v2085_v47 = vadd.f32 %v2084_v46, %v2083_v45 }
 0x49d   : > { %2086 = vadd.xlane.f32.xlu0 %v2085_v47 }
 0x526   : > { %v2087_v48 = vpop.xlane.xlu0 %2086 }
 0x527   : > { %v2088_v52 = vmul.f32 0.00390625, %v2087_v48 }
 0x529   : > { %v2089_v54 = vsub.f32 %v2083_v45, %v2088_v52  ;;  %v2090_v55 = vsub.f32 %v2084_v46, %v2088_v52 }
 0x52b   : > { %v2091_v58 = vmul.f32 %v2089_v54, %v2089_v54  ;;  %v2092_v59 = vmul.f32 %v2090_v55, %v2090_v55 }
 0x52d   : > { %v2093_v62 = vadd.f32 %v2092_v59, %v2091_v58 }
 0x52f   : > { %2094 = vadd.xlane.f32.xlu1 %v2093_v62 }
 0x540   : > { %2108 = vperm.xlu1 %4170, %v4670_v53  }
 0x544   : > { %4171 = vset.pattern.permute.xlu1 %v4302_v30 }
 0x545   : > { %2116 = vperm.xlu1 %4171, %v4670_v53  }
 0x549   : > { %2155 = vrot.lane.b32.xlu1 %v4425_v1, %s4305_s13 }
 0x54a   : > { %4174 = vset.pattern.permute.xlu1 %v4296_v23 }
 0x54d   : > { %2161 = vrot.lane.b32.xlu1 %v4430_v2, %s4305_s13 }
 0x551   : > { %2153 = vrot.lane.b32.xlu1 %v4621_v40, %s4305_s13 }
 0x555   : > { %2159 = vrot.lane.b32.xlu1 %v4623_v41, %s4305_s13 }
 0x559   : > { %2268 = vrot.lane.b32.xlu1 %v4430_v2, %s4306_s14 }
 0x55d   : > { %2266 = vrot.lane.b32.xlu1 %v4623_v41, %s4306_s14 }
 0x561   : > { %2367 = vrot.lane.b32.xlu1 %v4430_v2, %s4307_s17 }
 0x565   : > { %2365 = vrot.lane.b32.xlu1 %v4623_v41, %s4307_s17 }
 0x569   : > { %2474 = vrot.lane.b32.xlu1 %v4430_v2, %s4290_s15 }
 0x56d   : > { %2472 = vrot.lane.b32.xlu1 %v4623_v41, %s4290_s15 }
 0x571   : > { %2650 = vrot.lane.b32.xlu1 %v4430_v2, %s4291_s16 }
 0x5b8   : > { %v2095_v1 = vpop.xlane.xlu1 %2094 }
 0x5b9   : > { %v2096_v63 = vmul.f32 0.00390625, %v2095_v1 }
 0x5bb   : > { %v2097_v5 = vadd.f32 1e-05, %v2096_v63 }
 0x5bc   : > { %v2109_v7 = vpop.permute.xlu1 %2108 }
 0x5bd   : > { %4183 = vrsqrt.f32 %v2097_v5  ;;  %v2170_v5 = vld [vmem:[%s5365_s3] sm:$0xff] }
 0x5c0   : > { %v2117_v14 = vpop.permute.xlu1 %2116 }
 0x5c4   : > { %v2156_v15 = vpop.permute.xlu1 %2155 }
 0x5c8   : > { %v2162_v16 = vpop.permute.xlu1 %2161 }
 0x5c9   : > { %v4856_v8 = vsel %vm2163_vm8, %v2162_v16, %v2156_v15  ;;  %v4860_v9 = vsel %vm2163_vm8, %v2156_v15, %v2162_v16 }
 0x5ca   : > { %v4184_v2 = vpop.eup %4183  ;;  %2201 = vmatprep.subr.mxu0 %v4860_v9 }
 0x5cb   : > { %v2099_v17 = vmul.f32 %v4184_v2, %v4670_v53  ;;  %2202 = vmatpush1.msra.mxu0 %v4856_v8 }
 0x5cc   : > { %v2154_v18 = vpop.permute.xlu1 %2153 }
 0x5cd   : > { %2102 = vperm.xlu0 %4169, %v2099_v17  }
 0x5d0   : > { %v2160_v19 = vpop.permute.xlu1 %2159 }
 0x5d1   : > { %v4867_v20 = vsel %vm2163_vm8, %v2160_v19, %v2154_v18  ;;  %2262 = vrot.lane.b32.xlu0 %v4870_v11, %s4306_s14  ;;  %v4876_v12 = vsel %vm2163_vm8, %v2154_v18, %v2160_v19  ;;  %v4056_v19 = vld [vmem:[%s5365_s3 + $0x8] sm:$0xff] }
 0x5d2   : > { %2203 = vmatprep.subr.mxu0 %v4876_v12  ;;  %4172 = vset.pattern.permute.xlu0 %v4292_v3 }
 0x5d3   : > { %2204 = vmatpush1.msra.mxu0 %v4867_v20 }
 0x5d4   : > { %v2269_v25 = vpop.permute.xlu1 %2268 }
 0x5d5   : > { %2260 = vrot.lane.b32.xlu0 %v4621_v40, %s4306_s14 }
 0x5d8   : > { %v2267_v36 = vpop.permute.xlu1 %2266 }
 0x5d9   : > { %2361 = vrot.lane.b32.xlu0 %v4870_v11, %s4307_s17 }
 0x5dc   : > { %v2368_v43 = vpop.permute.xlu1 %2367 }
 0x5dd   : > { %2359 = vrot.lane.b32.xlu0 %v4621_v40, %s4307_s17 }
 0x5e0   : > { %v2366_v45 = vpop.permute.xlu1 %2365 }
 0x5e1   : > { %2468 = vrot.lane.b32.xlu0 %v4870_v11, %s4290_s15 }
 0x5e4   : > { %v2475_v47 = vpop.permute.xlu1 %2474 }
 0x5e5   : > { %2466 = vrot.lane.b32.xlu0 %v4621_v40, %s4290_s15 }
 0x5e8   : > { %v2473_v52 = vpop.permute.xlu1 %2472 }
 0x5e9   : > { %2644 = vrot.lane.b32.xlu0 %v4870_v11, %s4291_s16 }
 0x5ec   : > { %v4951_v58 = vpop.permute.xlu1 %2650 }
 0x648   : > { %v2103_v53 = vpop.permute.xlu0 %2102 }
 0x649   : > { %v2105_v21 = vmul.f32 %v2103_v53, %v2089_v54  ;;  %v2106_v22 = vmul.f32 %v2103_v53, %v2090_v55 }
 0x64b   : > { %v2111_v26 = vadd.f32 %v2109_v7, %v2105_v21  ;;  %v2112_v27 = vadd.f32 %v2109_v7, %v2106_v22 }
 0x64c   : > { %v2263_v28 = vpop.permute.xlu0 %2262 }
 0x64d   : > { %vm2113_vm10 = vcmp.ge.f32.partialorder %v2111_v26, 0.0  ;;  %vm2114_vm11 = vcmp.ge.f32.partialorder %v2112_v27, 0.0  ;;  %v2119_v29 = vmul.f32 %v2117_v14, %v2111_v26  ;;  %v2120_v4 = vmul.f32 %v2117_v14, %v2112_v27 }
 0x64e   : > { %v4896_v31 = vsel %vm2270_vm9, %v2269_v25, %v2263_v28  ;;  %v4900_v32 = vsel %vm2270_vm9, %v2263_v28, %v2269_v25 }
 0x64f   : > { %v4902_v33 = vsel %vm2113_vm10, %v2111_v26, %v2119_v29  ;;  %v4904_v34 = vsel %vm2114_vm11, %v2112_v27, %v2120_v4  ;;  %2308 = vmatprep.subr.mxu1 %v4900_v32  ;;  %v4058_v4 = vld [vmem:[%s5365_s3 + $0x10] sm:$0xff] }
 0x650   : > { %v2261_v37 = vpop.permute.xlu0 %2260  ;;  %2157 = vrot.lane.b32.xlu1 %v4904_v34, %s4305_s13  ;;  %2151 = vrot.lane.b32.xlu0 %v4902_v33, %s4305_s13  ;;  %s284_s13 = sand.u32 1, %s4273_s25  }
 0x651   : > { %v4913_v38 = vsel %vm2270_vm9, %v2267_v36, %v2261_v37  ;;  %2309 = vmatpush1.msra.mxu1 %v4896_v31  ;;  %v4918_v39 = vsel %vm2270_vm9, %v2261_v37, %v2267_v36 }
 0x652   : > { %2310 = vmatprep.subr.mxu1 %v4918_v39 }
 0x653   : > { %2311 = vmatpush1.msra.mxu1 %v4913_v38 }
 0x654   : > { %2264 = vrot.lane.b32.xlu1 %v4904_v34, %s4306_s14  ;;  %2258 = vrot.lane.b32.xlu0 %v4902_v33, %s4306_s14  ;;  %v2362_v44 = vpop.permute.xlu0 %2361  ;;  %s4010_s14 = sshll.u32 %s284_s13, 4 }
 0x655   : > { %v4969_v7 = vsel %vm2369_vm13, %v2362_v44, %v2368_v43  ;;  %v4973_v14 = vsel %vm2369_vm13, %v2368_v43, %v2362_v44  ;;  %v5027_v43 = vld [vmem:[%s4422_s8 + $0x8] sm:$0xff]  ;;  %s4089_s8 = sshll.u32 %s4370_s28, 8  ;;  %s3919_s28 = scalar_lea.sflag [#allocation5], %s284_s13 }
 0x656   : > { %s5321_s21 = scalar_lea.hbm %s5369_s7, %s4089_s8 }
 0x658   : > { %2363 = vrot.lane.b32.xlu1 %v4904_v34, %s4307_s17  ;;  %2357 = vrot.lane.b32.xlu0 %v4902_v33, %s4307_s17  ;;  %v2360_v46 = vpop.permute.xlu0 %2359  ;;  %s286_s17 = scalar_lea.vmem [#allocation6], %s4010_s14 }
 0x659   : > { %v4988_v18 = vsel %vm2369_vm13, %v2360_v46, %v2366_v45  ;;  %v4996_v53 = vsel %vm2369_vm13, %v2366_v45, %v2360_v46  ;;  %s3933_s18 = sshll.u32 %s286_s17, 4  ;;  %s5323_s18 = int_to_ptr.vmem [resolvable:$true] %s3933_s18 }
 0x65a   : > { %s4217_s22 = scalar_lea.vmem %s5323_s18, 256  ;;  %p4224_p11 = scmp.lt.s32.totalorder %s5323_s18, %s4222_s29 }
 0x65b   : > { %p4218_p6 = scmp.ne.s32.totalorder %s5323_s18, %s4217_s22  ;;  %p4225_p12 = scmp.lt.s32.totalorder %s4223_s9, %s4217_s22 }
 0x65c   : > { %2470 = vrot.lane.b32.xlu1 %v4904_v34, %s4290_s15  ;;  %2464 = vrot.lane.b32.xlu0 %v4902_v33, %s4290_s15  ;;  %v2469_v48 = vpop.permute.xlu0 %2468 }
 0x65d   : > { %v2478_v21 = vsel %vm627_vm4, %v2469_v48, %v2475_v47  ;;  %v2481_v22 = vsel %vm627_vm4, %v2475_v47, %v2469_v48  ;;  %v4060_v47 = vld [vmem:[%s5365_s3 + $0x18] sm:$0xff]  ;;  %p4219_p9 = pnand %p4218_p6, %p4387_p5  ;;  %p4226_p13 = por %p4225_p12, %p4224_p11 }
 0x65f   : > { %p4220_p10 = pneg %p4219_p9 }
 0x660   : > { %2648 = vrot.lane.b32.xlu1 %v4623_v41, %s4291_s16  ;;  %2642 = vrot.lane.b32.xlu0 %v4621_v40, %s4291_s16  ;;  %v2467_v54 = vpop.permute.xlu0 %2466 }
 0x661   : > { %v2477_v29 = vsel %vm627_vm4, %v2467_v54, %v2473_v52  ;;  %v2480_v36 = vsel %vm627_vm4, %v2473_v52, %v2467_v54  ;;  %p4227_p0 = pnand %p4226_p13, %p4220_p10 }
 0x664   : > { %2646 = vrot.lane.b32.xlu1 %v4904_v34, %s4291_s16  ;;  %2640 = vrot.lane.b32.xlu0 %v4902_v33, %s4291_s16  ;;  %v4949_v55 = vpop.permute.xlu0 %2644 }
 0x665   : > { %v2657_v52 = vsel %vm792_vm5, %v4951_v58, %v4949_v55 }
 0x668   : > { %2998 = vperm.xlu0 %4172, %v4945_v42  }
 0x66c   : > { %4173 = vset.pattern.permute.xlu0 %v4297_v24 }
 0x6c2   : > { %v2152_v59 = vpop.permute.xlu0 %2151  ;;  %v2158_v62 = vpop.permute.xlu1 %2157 }
 0x6c3   : > { %v4955_v1 = vsel %vm2163_vm8, %v2158_v62, %v2152_v59  ;;  %v4959_v63 = vsel %vm2163_vm8, %v2152_v59, %v2158_v62  ;;  %v4062_v59 = vld [vmem:[%s5365_s3 + $0x20] sm:$0xff]  ;;  %v2654_v62 = vsel %vm792_vm5, %v4949_v55, %v4951_v58 }
 0x6c4   : > { %2205 = vmatprep.subr.mxu0 %v4959_v63 }
 0x6c5   : > { %2206 = vmatpush1.msra.mxu0 %v4955_v1 }
 0x6c6   : > { %v2259_v15 = vpop.permute.xlu0 %2258  ;;  %2407 = vmatprep.subr.mxu0 %v4969_v7  ;;  %v2265_v16 = vpop.permute.xlu1 %2264  ;;  %4055 = vmatmul.mubr.msk.f32.vlgmr.msra.gmra.mxu0 %vm2171_vm12, %v2170_v5 }
 0x6c7   : > { %v4979_v2 = vsel %vm2270_vm9, %v2265_v16, %v2259_v15  ;;  %2408 = vmatpush1.msra.mxu0 %v4973_v14  ;;  %v4984_v17 = vsel %vm2270_vm9, %v2259_v15, %v2265_v16  ;;  %2445 = vmatprep.mubr.f32.mxu0 %v4286_v0 }
 0x6c8   : > { %2312 = vmatprep.subr.mxu1 %v4984_v17  ;;  %2409 = vmatprep.subr.mxu0 %v4988_v18 }
 0x6c9   : > { %2313 = vmatpush1.msra.mxu1 %v4979_v2  ;;  %2410 = vmatpush1.msra.mxu0 %v4996_v53 }
 0x6ca   : > { %v2358_v25 = vpop.permute.xlu0 %2357  ;;  %2513 = vmatprep.subr.mxu1 %v2478_v21  ;;  %v2364_v26 = vpop.permute.xlu1 %2363  ;;  %4057 = vmatmul.mubr.msk.f32.vlgmr.msra.gmra.mxu1 %vm2171_vm12, %v4056_v19 }
 0x6cb   : > { %v5009_v27 = vsel %vm2369_vm13, %v2364_v26, %v2358_v25  ;;  %2514 = vmatpush1.msra.mxu1 %v2481_v22  ;;  %v5013_v28 = vsel %vm2369_vm13, %v2358_v25, %v2364_v26  ;;  %2551 = vmatprep.mubr.f32.mxu1 %v4286_v0 }
 0x6cc   : > { %2411 = vmatprep.subr.mxu0 %v5013_v28  ;;  %2515 = vmatprep.subr.mxu1 %v2477_v29 }
 0x6cd   : > { %2412 = vmatpush1.msra.mxu0 %v5009_v27  ;;  %2516 = vmatpush1.msra.mxu1 %v2480_v36 }
 0x6ce   : > { %v2465_v37 = vpop.permute.xlu0 %2464  ;;  %4059 = vmatmul.mubr.msk.f32.vlgmr.msra.gmra.mxu0 %vm2171_vm12, %v4058_v4  ;;  %2593 = vmatprep.subr.mxu0 %v5027_v43  ;;  %v2471_v44 = vpop.permute.xlu1 %2470 }
 0x6cf   : > { %v2479_v45 = vsel %vm627_vm4, %v2471_v44, %v2465_v37  ;;  %2594 = vmatpush1.msra.mxu0 %v4870_v11  ;;  %v2476_v46 = vsel %vm627_vm4, %v2465_v37, %v2471_v44  ;;  %2631 = vmatprep.mubr.f32.mxu0 %v4286_v0 }
 0x6d0   : > { %2517 = vmatprep.subr.mxu1 %v2476_v46  ;;  %2595 = vmatprep.subr.mxu0 %v4623_v41 }
 0x6d1   : > { %2518 = vmatpush1.msra.mxu1 %v2479_v45  ;;  %2596 = vmatpush1.msra.mxu0 %v4621_v40  ;;  %v4054_v45 = vsel %vm2138_vm15, 1.0, %v4286_v0 }
 0x6d2   : > { %v2643_v48 = vpop.permute.xlu0 %2642  ;;  %4061 = vmatmul.mubr.msk.f32.vlgmr.msra.gmra.mxu1 %vm2171_vm12, %v4060_v47  ;;  %2597 = vmatprep.subr.mxu0 %v4904_v34  ;;  %v2649_v54 = vpop.permute.xlu1 %2648 }
 0x6d3   : > { %2689 = vmatprep.subr.mxu1 %v2657_v52  ;;  %v2653_v5 = vsel %vm792_vm5, %v2643_v48, %v2649_v54  ;;  %2598 = vmatpush1.msra.mxu0 %v4902_v33  ;;  %v2656_v15 = vsel %vm792_vm5, %v2649_v54, %v2643_v48 }
 0x6d4   : > { %2690 = vmatpush1.msra.mxu1 %v2654_v62  ;;  %2769 = vmatprep.subr.mxu0 %v4856_v8  ;;  %v4064_v8 = vld [vmem:[%s5365_s3 + $0x28] sm:$0xff] }
 0x6d5   : > { %2691 = vmatprep.subr.mxu1 %v2656_v15  ;;  %4063 = vmatmul.mubr.msk.f32.vlgmr.msra.gmra.mxu0 %vm2171_vm12, %v4062_v59  ;;  %v2148_v59 = vmul.f32 %v4054_v45, %v4541_v57 }
 0x6d6   : > { %2692 = vmatpush1.msra.mxu1 %v2653_v5  ;;  %2770 = vmatpush1.msra.mxu0 %v4860_v9  ;;  %v2641_v16 = vpop.permute.xlu0 %2640  ;;  %v2647_v55 = vpop.permute.xlu1 %2646  ;;  %v4066_v9 = vld [vmem:[%s5365_s3 + $0x30] sm:$0xff] }
 0x6d7   : > { %2771 = vmatprep.subr.mxu0 %v4867_v20  ;;  %v2652_v58 = vsel %vm792_vm5, %v2641_v16, %v2647_v55  ;;  %v2655_v19 = vsel %vm792_vm5, %v2647_v55, %v2641_v16  ;;  %2727 = vmatprep.mubr.f32.mxu1 %v4286_v0  ;;  %v4068_v20 = vld [vmem:[%s5365_s3 + $0x38] sm:$0xff] }
 0x6d8   : > { %2772 = vmatpush1.msra.mxu0 %v4876_v12  ;;  %2693 = vmatprep.subr.mxu1 %v2655_v19  ;;  %v4070_v12 = vld [vmem:[%s5365_s3 + $0x40] sm:$0xff] }
 0x6d9   : > { %2773 = vmatprep.subr.mxu0 %v4955_v1  ;;  %2694 = vmatpush1.msra.mxu1 %v2652_v58 }
 0x6da   : > { %2774 = vmatpush1.msra.mxu0 %v4959_v63  ;;  %4065 = vmatmul.mubr.msk.f32.vlgmr.msra.gmra.mxu1 %vm2171_vm12, %v4064_v8  ;;  %v2821_v8 = vrot.slane %v2148_v59, %v4524_v49 }
 0x6db   : > { %2807 = vmatprep.mubr.f32.mxu0 %v4286_v0  ;;  %2857 = vmatprep.subr.mxu1 %v4896_v31  ;;  %v4053_v31 = vsel %vm2131_vm14, 1.0, %v4286_v0 }
 0x6dc   : > { %2937 = vmatprep.subr.mxu0 %v4973_v14  ;;  %4067 = vmatmul.mubr.msk.f32.vlgmr.msra.gmra.mxu0 %vm2171_vm12, %v4066_v9  ;;  %v2145_v1 = vmul.f32 %v4053_v31, %v4539_v56 }
 0x6dd   : > { %2858 = vmatpush1.msra.mxu1 %v4900_v32  ;;  %2938 = vmatpush1.msra.mxu0 %v4969_v7  ;;  %v2143_v32 = vmul.f32 %v4053_v31, %v4531_v51 }
 0x6de   : > { %2859 = vmatprep.subr.mxu1 %v4913_v38  ;;  %2939 = vmatprep.subr.mxu0 %v4996_v53 }
 0x6df   : > { %2860 = vmatpush1.msra.mxu1 %v4918_v39  ;;  %2940 = vmatpush1.msra.mxu0 %v4988_v18  ;;  %v2249_v39 = vrot.slane %v2143_v32, %v4524_v49 }
 0x6e0   : > { %2861 = vmatprep.subr.mxu1 %v4979_v2  ;;  %2941 = vmatprep.subr.mxu0 %v5009_v27 }
 0x6e1   : > { %2862 = vmatpush1.msra.mxu1 %v4984_v17  ;;  %2895 = vmatprep.mubr.f32.mxu1 %v4286_v0  ;;  %v2455_v17 = vrot.slane %v2145_v1, %v4524_v49 }
 0x6e2   : > { %2942 = vmatpush1.msra.mxu0 %v5013_v28  ;;  %2975 = vmatprep.mubr.f32.mxu0 %v4286_v0 }
 0x6e3   : > { %4069 = vmatmul.mubr.msk.f32.vlgmr.msra.gmra.mxu1 %vm2171_vm12, %v4068_v20  ;;  %4071 = vmatmul.mubr.msk.f32.vlgmr.msra.gmra.mxu0 %vm2171_vm12, %v4070_v12 }
 0x6e4   : > { %3212 = vmatprep.subr.mxu0 %v4870_v11  ;;  %3252 = vmatprep.mubr.f32.mxu0 %v4286_v0 }
 0x6e5   : > { %3213 = vmatpush1.msra.mxu0 %v5027_v43  ;;  %3164 = vmatprep.mubr.f32.mxu1 %v4286_v0 }
 0x6e6   : > { %3214 = vmatprep.subr.mxu0 %v4621_v40 }
 0x6e7   : > { %3215 = vmatpush1.msra.mxu0 %v4623_v41 }
 0x6e8   : > { %3216 = vmatprep.subr.mxu0 %v4902_v33 }
 0x6e9   : > { %3217 = vmatpush1.msra.mxu0 %v4904_v34 }
 0x786   : > { %v2241_v38 = vpop.f32.mrf.mxu0 }
 0x787   : > { %v2254_v14 = vmul.f32 %v2249_v39, %v2241_v38 }
 0x788   : > { %v2243_v63 = vpop.f32.mrf.mxu0 }
 0x789   : > { %v2255_v28 = vmul.f32 %v2243_v63, %v4547_v60 }
 0x78a   : > { %v2348_v7 = vpop.f32.mrf.mxu1 }
 0x78b   : > { %v2353_v2 = vmul.f32 %v4053_v31, %v2348_v7  ;;  %v2150_v31 = vmul.f32 %v4054_v45, %v4549_v61 }
 0x78c   : > { %v2350_v53 = vpop.f32.mrf.mxu1 }
 0x78d   : > { %v2355_v21 = vadd.f32 %v2353_v2, %v2254_v14  ;;  %v2356_v46 = vadd.f32 %v2350_v53, %v2255_v28  ;;  %v2989_v14 = vrot.slane %v2150_v31, %v4524_v49 }
 0x78e   : > { %v2447_v18 = vpop.f32.mrf.mxu0 }
 0x78f   : > { %v2460_v22 = vmul.f32 %v2455_v17, %v2447_v18 }
 0x790   : > { %v2449_v26 = vpop.f32.mrf.mxu0 }
 0x791   : > { %v2462_v29 = vadd.f32 %v2460_v22, %v2355_v21  ;;  %v2461_v36 = vmul.f32 %v2449_v26, %v4558_v13  ;;  %v2999_v26 = vpop.permute.xlu0 %2998 }
 0x792   : > { %v2553_v25 = vpop.f32.mrf.mxu1 }
 0x793   : > { %v2558_v27 = vmul.f32 %v2553_v25, %v4531_v51  ;;  %v2463_v48 = vadd.f32 %v2461_v36, %v2356_v46 }
 0x794   : > { %v2555_v4 = vpop.f32.mrf.mxu1 }
 0x795   : > { %v2633_v37 = vpop.f32.mrf.mxu0  ;;  %v2560_v44 = vadd.f32 %v2558_v27, %v2462_v29  ;;  %v2559_v47 = vmul.f32 %v2555_v4, %v4541_v57 }
 0x797   : > { %v2635_v52 = vpop.f32.mrf.mxu0  ;;  %v2638_v62 = vadd.f32 %v2633_v37, %v2560_v44  ;;  %v2561_v10 = vadd.f32 %v2559_v47, %v2463_v48 }
 0x799   : > { %v2639_v20 = vadd.f32 %v2635_v52, %v2561_v10 }
 0x79a   : > { %v2729_v54 = vpop.f32.mrf.mxu1 }
 0x79b   : > { %v2734_v5 = vmul.f32 %v2729_v54, %v4539_v56 }
 0x79c   : > { %v2731_v15 = vpop.f32.mrf.mxu1  ;;  %v2809_v16 = vpop.f32.mrf.mxu0 }
 0x79d   : > { %v2736_v55 = vadd.f32 %v2734_v5, %v2638_v62  ;;  %v2822_v58 = vmul.f32 %v2809_v16, %v4569_v35  ;;  %v2735_v19 = vmul.f32 %v2731_v15, %v4549_v61 }
 0x79e   : > { %v2811_v9 = vpop.f32.mrf.mxu0 }
 0x79f   : > { %v2824_v12 = vadd.f32 %v2822_v58, %v2736_v55  ;;  %v2737_v32 = vadd.f32 %v2735_v19, %v2639_v20  ;;  %v2823_v38 = vmul.f32 %v2821_v8, %v2811_v9 }
 0x7a1   : > { %v2825_v18 = vadd.f32 %v2823_v38, %v2737_v32 }
 0x7a3   : > { %v2897_v39 = vpop.f32.mrf.mxu1  ;;  %v2977_v1 = vpop.f32.mrf.mxu0 }
 0x7a4   : > { %v2904_v63 = vadd.f32 %v2897_v39, %v2824_v12  ;;  %v2990_v7 = vmul.f32 %v2977_v1, %v4577_v50  ;;  %v3184_v12 = vld [vmem:[#allocation3 + $0x8] sm:$0xff] }
 0x7a5   : > { %v2899_v2 = vpop.f32.mrf.mxu1  ;;  %v2979_v17 = vpop.f32.mrf.mxu0 }
 0x7a6   : > { %v2903_v53 = vmul.f32 %v4054_v45, %v2899_v2  ;;  %v2992_v21 = vadd.f32 %v2990_v7, %v2904_v63  ;;  %v2991_v25 = vmul.f32 %v2989_v14, %v2979_v17 }
 0x7a8   : > { %v2905_v22 = vadd.f32 %v2903_v53, %v2825_v18  ;;  %v3001_v28 = vadd.f32 %v2999_v26, %v2992_v21  ;;  %v5215_v53 = vld [vmem:[%s5367_s5 + $0x18] sm:$0xff] }
 0x7aa   : > { %v2993_v27 = vadd.f32 %v2991_v25, %v2905_v22 }
 0x7ac   : > { %v3002_v29 = vadd.f32 %v2999_v26, %v2993_v27 }
 0x7ae   : > { %v3003_v4 = vadd.f32 %v3002_v29, %v3001_v28 }
 0x7b0   : > { %3004 = vadd.xlane.f32.xlu1 %v3003_v4 }
 0x839   : > { %v3005_v36 = vpop.xlane.xlu1 %3004 }
 0x83a   : > { %v3006_v37 = vmul.f32 0.00390625, %v3005_v36  ;;  %v3095_v36 = vld [vmem:[#allocation3] sm:$0xff] }
 0x83c   : > { %v3007_v44 = vsub.f32 %v3001_v28, %v3006_v37  ;;  %v3008_v46 = vsub.f32 %v3002_v29, %v3006_v37 }
 0x83e   : > { %v3009_v47 = vmul.f32 %v3007_v44, %v3007_v44  ;;  %v3010_v48 = vmul.f32 %v3008_v46, %v3008_v46 }
 0x840   : > { %v3011_v52 = vadd.f32 %v3010_v48, %v3009_v47 }
 0x842   : > { %3012 = vadd.xlane.f32.xlu0 %v3011_v52 }
 0x858   : > { %3026 = vperm.xlu0 %4173, %v4945_v42  }
 0x85c   : > { %3277 = vrot.lane.b32.xlu0 %v5027_v43, %s4291_s16 }
 0x85d   : > { %4177 = vset.pattern.permute.xlu0 %v4296_v23 }
 0x860   : > { %3275 = vrot.lane.b32.xlu0 %v4623_v41, %s4291_s16 }
 0x8cb   : > { %v3013_v45 = vpop.xlane.xlu0 %3012 }
 0x8cc   : > { %v3014_v54 = vmul.f32 0.00390625, %v3013_v45 }
 0x8ce   : > { %v3015_v59 = vadd.f32 1e-05, %v3014_v54 }
 0x8d0   : > { %4185 = vrsqrt.f32 %v3015_v59 }
 0x8d3   : > { %v3027_v10 = vpop.permute.xlu0 %3026 }
 0x8d7   : > { %v3278_v21 = vpop.permute.xlu0 %3277 }
 0x8db   : > { %v3276_v25 = vpop.permute.xlu0 %3275 }
 0x8dd   : > { %v4186_v62 = vpop.eup %4185 }
 0x8de   : > { %v3017_v5 = vmul.f32 %v4186_v62, %v4945_v42 }
 0x8e0   : > { %3020 = vperm.xlu1 %4174, %v3017_v5  }
 0x8e4   : > { %4175 = vset.pattern.permute.xlu1 %v4302_v30 }
 0x8e5   : > { %3034 = vperm.xlu1 %4175, %v4945_v42  }
 0x8e9   : > { %3077 = vrot.lane.b32.xlu1 %v4870_v11, %s4290_s15 }
 0x8ea   : > { %4176 = vset.pattern.permute.xlu1 %v4292_v3 }
 0x8ed   : > { %3085 = vrot.lane.b32.xlu1 %v5027_v43, %s4290_s15 }
 0x8f1   : > { %3075 = vrot.lane.b32.xlu1 %v4621_v40, %s4290_s15 }
 0x8f5   : > { %3083 = vrot.lane.b32.xlu1 %v4623_v41, %s4290_s15 }
 0x8f9   : > { %3073 = vrot.lane.b32.xlu1 %v4902_v33, %s4290_s15 }
 0x8fd   : > { %3081 = vrot.lane.b32.xlu1 %v4904_v34, %s4290_s15 }
 0x901   : > { %3269 = vrot.lane.b32.xlu1 %v4870_v11, %s4291_s16 }
 0x905   : > { %3267 = vrot.lane.b32.xlu1 %v4621_v40, %s4291_s16 }
 0x95b   : > { %v3021_v3 = vpop.permute.xlu1 %3020 }
 0x95c   : > { %v3023_v23 = vmul.f32 %v3021_v3, %v3007_v44  ;;  %v3024_v42 = vmul.f32 %v3021_v3, %v3008_v46 }
 0x95e   : > { %v3029_v15 = vadd.f32 %v3027_v10, %v3023_v23  ;;  %v3030_v16 = vadd.f32 %v3027_v10, %v3024_v42  ;;  %v3288_v23 = vld [vmem:[#allocation3 + $0x10] sm:$0xff]  ;;  %v3534_v42 = vld [vmem:[#allocation3 + $0x28] sm:$0xff] }
 0x960   : > { %v3035_v55 = vpop.permute.xlu1 %3034  ;;  %vm3032_vm0 = vcmp.ge.f32.partialorder %v3030_v16, 0.0  ;;  %vm3031_vm1 = vcmp.ge.f32.partialorder %v3029_v15, 0.0 }
 0x961   : > { %v3037_v58 = vmul.f32 %v3035_v55, %v3029_v15  ;;  %v3038_v19 = vmul.f32 %v3035_v55, %v3030_v16 }
 0x963   : > { %v5156_v8 = vsel %vm3032_vm0, %v3030_v16, %v3038_v19  ;;  %v5158_v9 = vsel %vm3031_vm1, %v3029_v15, %v3037_v58 }
 0x964   : > { %v3078_v20 = vpop.permute.xlu1 %3077  ;;  %3079 = vrot.lane.b32.xlu0 %v5156_v8, %s4290_s15  ;;  %3071 = vrot.lane.b32.xlu1 %v5158_v9, %s4290_s15 }
 0x965   : > { %3218 = vmatprep.subr.mxu0 %v5158_v9 }
 0x966   : > { %3219 = vmatpush1.msra.mxu0 %v5156_v8 }
 0x967   : > { %4074 = vmatmul.mubr.msk.f32.vlgmr.msra.gmra.mxu0 %vm3096_vm2, %v3184_v12 }
 0x968   : > { %v3086_v31 = vpop.permute.xlu1 %3085  ;;  %3273 = vrot.lane.b32.xlu0 %v4904_v34, %s4291_s16  ;;  %3265 = vrot.lane.b32.xlu1 %v4902_v33, %s4291_s16 }
 0x969   : > { %v5173_v32 = vsel %vm627_vm4, %v3086_v31, %v3078_v20  ;;  %v5177_v38 = vsel %vm627_vm4, %v3078_v20, %v3086_v31  ;;  %3444 = vmatprep.mubr.f32.mxu0 %v4286_v0 }
 0x96a   : > { %3124 = vmatprep.subr.mxu1 %v5173_v32  ;;  %3404 = vmatprep.subr.mxu0 %v5177_v38 }
 0x96b   : > { %3125 = vmatpush1.msra.mxu1 %v5177_v38  ;;  %3405 = vmatpush1.msra.mxu0 %v5173_v32 }
 0x96c   : > { %v3076_v39 = vpop.permute.xlu1 %3075  ;;  %3271 = vrot.lane.b32.xlu0 %v5156_v8, %s4291_s16  ;;  %3263 = vrot.lane.b32.xlu1 %v5158_v9, %s4291_s16 }
 0x970   : > { %v3084_v1 = vpop.permute.xlu1 %3083  ;;  %3873 = vperm.xlu1 %4176, %v5215_v53  }
 0x971   : > { %v5190_v63 = vsel %vm627_vm4, %v3084_v1, %v3076_v39  ;;  %v5194_v7 = vsel %vm627_vm4, %v3076_v39, %v3084_v1 }
 0x972   : > { %3126 = vmatprep.subr.mxu1 %v5190_v63  ;;  %3406 = vmatprep.subr.mxu0 %v5194_v7 }
 0x973   : > { %3127 = vmatpush1.msra.mxu1 %v5194_v7  ;;  %3407 = vmatpush1.msra.mxu0 %v5190_v63 }
 0x974   : > { %v3074_v14 = vpop.permute.xlu1 %3073  ;;  %4178 = vset.pattern.permute.xlu1 %v4297_v24  ;;  %v3376_v24 = vld [vmem:[#allocation3 + $0x18] sm:$0xff] }
 0x978   : > { %v3082_v2 = vpop.permute.xlu1 %3081 }
 0x979   : > { %v5202_v17 = vsel %vm627_vm4, %v3082_v2, %v3074_v14  ;;  %v5206_v18 = vsel %vm627_vm4, %v3074_v14, %v3082_v2 }
 0x97a   : > { %3128 = vmatprep.subr.mxu1 %v5202_v17  ;;  %3408 = vmatprep.subr.mxu0 %v5206_v18 }
 0x97b   : > { %3129 = vmatpush1.msra.mxu1 %v5206_v18  ;;  %3409 = vmatpush1.msra.mxu0 %v5202_v17 }
 0x97c   : > { %v3270_v22 = vpop.permute.xlu1 %3269 }
 0x97d   : > { %v5233_v37 = vsel %vm792_vm5, %v3270_v22, %v3278_v21  ;;  %v5237_v44 = vsel %vm792_vm5, %v3278_v21, %v3270_v22  ;;  %v3068_v21 = vmul.f32 0.0, %v4541_v57 }
 0x980   : > { %v3268_v26 = vpop.permute.xlu1 %3267 }
 0x981   : > { %v3281_v48 = vsel %vm792_vm5, %v3268_v26, %v3276_v25  ;;  %v3285_v52 = vsel %vm792_vm5, %v3276_v25, %v3268_v26 }
 0x9d6   : > { %v3072_v27 = vpop.permute.xlu1 %3071  ;;  %v3080_v28 = vpop.permute.xlu0 %3079 }
 0x9d7   : > { %v5221_v29 = vsel %vm627_vm4, %v3080_v28, %v3072_v27  ;;  %v5225_v4 = vsel %vm627_vm4, %v3072_v27, %v3080_v28 }
 0x9d8   : > { %3130 = vmatprep.subr.mxu1 %v5221_v29  ;;  %3410 = vmatprep.subr.mxu0 %v5225_v4 }
 0x9d9   : > { %3131 = vmatpush1.msra.mxu1 %v5225_v4  ;;  %3411 = vmatpush1.msra.mxu0 %v5221_v29 }
 0x9da   : > { %v3266_v46 = vpop.permute.xlu1 %3265  ;;  %3316 = vmatprep.subr.mxu1 %v5233_v37  ;;  %3562 = vmatprep.subr.mxu0 %v5237_v44  ;;  %v3274_v47 = vpop.permute.xlu0 %3273 }
 0x9db   : > { %4073 = vmatmul.mubr.msk.f32.vlgmr.msra.gmra.mxu1 %vm3096_vm2, %v3095_v36  ;;  %4076 = vmatmul.mubr.msk.f32.vlgmr.msra.gmra.mxu0 %vm3096_vm2, %v3376_v24  ;;  %v3280_v54 = vsel %vm792_vm5, %v3266_v46, %v3274_v47  ;;  %v3284_v59 = vsel %vm792_vm5, %v3274_v47, %v3266_v46 }
 0x9dc   : > { %3317 = vmatpush1.msra.mxu1 %v5237_v44  ;;  %3563 = vmatpush1.msra.mxu0 %v5233_v37 }
 0x9dd   : > { %3318 = vmatprep.subr.mxu1 %v3281_v48  ;;  %3564 = vmatprep.subr.mxu0 %v3285_v52 }
 0x9de   : > { %3319 = vmatpush1.msra.mxu1 %v3285_v52  ;;  %3565 = vmatpush1.msra.mxu0 %v3281_v48  ;;  %v3264_v45 = vpop.permute.xlu1 %3263  ;;  %v3272_v62 = vpop.permute.xlu0 %3271 }
 0x9df   : > { %3320 = vmatprep.subr.mxu1 %v3280_v54  ;;  %3566 = vmatprep.subr.mxu0 %v3284_v59  ;;  %v3279_v5 = vsel %vm792_vm5, %v3264_v45, %v3272_v62  ;;  %v3283_v3 = vsel %vm792_vm5, %v3272_v62, %v3264_v45 }
 0x9e0   : > { %3321 = vmatpush1.msra.mxu1 %v3284_v59  ;;  %3567 = vmatpush1.msra.mxu0 %v3280_v54 }
 0x9e1   : > { %3322 = vmatprep.subr.mxu1 %v3279_v5  ;;  %3568 = vmatprep.subr.mxu0 %v3283_v3 }
 0x9e2   : > { %3323 = vmatpush1.msra.mxu1 %v3283_v3  ;;  %3356 = vmatprep.mubr.f32.mxu1 %v4286_v0 }
 0x9e3   : > { %3569 = vmatpush1.msra.mxu0 %v3279_v5  ;;  %4075 = vmatmul.mubr.msk.f32.vlgmr.msra.gmra.mxu1 %vm3096_vm2, %v3288_v23 }
 0x9e4   : > { %3484 = vmatprep.subr.mxu1 %v5027_v43  ;;  %3602 = vmatprep.mubr.f32.mxu0 %v4286_v0 }
 0x9e5   : > { %3730 = vmatprep.subr.mxu0 %v4870_v11  ;;  %3485 = vmatpush1.msra.mxu1 %v4870_v11  ;;  %v3782_v11 = vld [vmem:[#allocation3 + $0x40] sm:$0xff] }
 0x9e6   : > { %4078 = vmatmul.mubr.msk.f32.vlgmr.msra.gmra.mxu0 %vm3096_vm2, %v3534_v42  ;;  %3486 = vmatprep.subr.mxu1 %v4623_v41 }
 0x9e7   : > { %3731 = vmatpush1.msra.mxu0 %v5027_v43  ;;  %3487 = vmatpush1.msra.mxu1 %v4621_v40  ;;  %v3065_v43 = vmul.f32 0.0, %v4539_v56 }
 0x9e8   : > { %3732 = vmatprep.subr.mxu0 %v4621_v40  ;;  %3488 = vmatprep.subr.mxu1 %v4904_v34  ;;  %v3702_v40 = vld [vmem:[#allocation3 + $0x38] sm:$0xff] }
 0x9e9   : > { %3733 = vmatpush1.msra.mxu0 %v4623_v41  ;;  %3489 = vmatpush1.msra.mxu1 %v4902_v33  ;;  %v3614_v41 = vld [vmem:[#allocation3 + $0x30] sm:$0xff] }
 0x9ea   : > { %3734 = vmatprep.subr.mxu0 %v4902_v33  ;;  %3490 = vmatprep.subr.mxu1 %v5156_v8 }
 0x9eb   : > { %3735 = vmatpush1.msra.mxu0 %v4904_v34  ;;  %3491 = vmatpush1.msra.mxu1 %v5158_v9  ;;  %v3063_v34 = vmul.f32 0.0, %v4531_v51 }
 0x9ec   : > { %3736 = vmatprep.subr.mxu0 %v5158_v9  ;;  %3524 = vmatprep.mubr.f32.mxu1 %v4286_v0 }
 0x9ed   : > { %3737 = vmatpush1.msra.mxu0 %v5156_v8  ;;  %4077 = vmatmul.mubr.msk.f32.vlgmr.msra.gmra.mxu1 %vm3096_vm2, %v3456_v6  ;;  %v3174_v16 = vrot.slane %v3063_v34, %v4524_v49  ;;  %v3874_v6 = vpop.permute.xlu1 %3873 }
 0x9ee   : > { %3642 = vmatprep.subr.mxu1 %v5173_v32  ;;  %3682 = vmatprep.mubr.f32.mxu1 %v4286_v0 }
 0x9ef   : > { %3643 = vmatpush1.msra.mxu1 %v5177_v38  ;;  %3770 = vmatprep.mubr.f32.mxu0 %v4286_v0 }
 0x9f0   : > { %3644 = vmatprep.subr.mxu1 %v5190_v63  ;;  %4080 = vmatmul.mubr.msk.f32.vlgmr.msra.gmra.mxu0 %vm3096_vm2, %v3702_v40 }
 0x9f1   : > { %3645 = vmatpush1.msra.mxu1 %v5194_v7 }
 0x9f2   : > { %3646 = vmatprep.subr.mxu1 %v5202_v17 }
 0x9f3   : > { %3647 = vmatpush1.msra.mxu1 %v5206_v18 }
 0x9f4   : > { %3648 = vmatprep.subr.mxu1 %v5221_v29 }
 0x9f5   : > { %3649 = vmatpush1.msra.mxu1 %v5225_v4 }
 0x9f6   : > { %4079 = vmatmul.mubr.msk.f32.vlgmr.msra.gmra.mxu1 %vm3096_vm2, %v3614_v41  ;;  %3810 = vmatprep.subr.mxu1 %v5233_v37 }
 0x9f7   : > { %3811 = vmatpush1.msra.mxu1 %v5237_v44  ;;  %3850 = vmatprep.mubr.f32.mxu1 %v4286_v0  ;;  %v3366_v0 = vrot.slane %v3065_v43, %v4524_v49 }
 0x9f8   : > { %3812 = vmatprep.subr.mxu1 %v3281_v48 }
 0x9f9   : > { %3813 = vmatpush1.msra.mxu1 %v3285_v52 }
 0x9fa   : > { %3814 = vmatprep.subr.mxu1 %v3280_v54 }
 0x9fb   : > { %3815 = vmatpush1.msra.mxu1 %v3284_v59 }
 0x9fc   : > { %3816 = vmatprep.subr.mxu1 %v3279_v5 }
 0x9fd   : > { %3817 = vmatpush1.msra.mxu1 %v3283_v3 }
 0x9fe   : > { %4081 = vmatmul.mubr.msk.f32.vlgmr.msra.gmra.mxu1 %vm3096_vm2, %v3782_v11 }
 0xa27   : > { %v3254_v15 = vpop.f32.mrf.mxu0 }
 0xa28   : > { %v3259_v8 = vmul.f32 0.0, %v3254_v15 }
 0xa29   : > { %v3256_v58 = vpop.f32.mrf.mxu0 }
 0xa9b   : > { %v3166_v33 = vpop.f32.mrf.mxu1  ;;  %v3446_v20 = vpop.f32.mrf.mxu0 }
 0xa9c   : > { %v3179_v19 = vmul.f32 %v3174_v16, %v3166_v33  ;;  %v3451_v7 = vmul.f32 %v3446_v20, %v4531_v51 }
 0xa9d   : > { %v3168_v10 = vpop.f32.mrf.mxu1  ;;  %v3448_v39 = vpop.f32.mrf.mxu0 }
 0xa9e   : > { %v3180_v12 = vmul.f32 %v3168_v10, %v4547_v60  ;;  %v3261_v32 = vadd.f32 %v3259_v8, %v3179_v19  ;;  %v3452_v18 = vmul.f32 %v3448_v39, %v4541_v57  ;;  %v3070_v57 = vmul.f32 0.0, %v4549_v61 }
 0xaa0   : > { %v3262_v1 = vadd.f32 %v3256_v58, %v3180_v12  ;;  %v3864_v54 = vrot.slane %v3070_v57, %v4524_v49 }
 0xaa3   : > { %v3358_v55 = vpop.f32.mrf.mxu1 }
 0xaa4   : > { %v3371_v31 = vmul.f32 %v3366_v0, %v3358_v55 }
 0xaa5   : > { %v3360_v9 = vpop.f32.mrf.mxu1 }
 0xaa6   : > { %v3372_v38 = vmul.f32 %v3360_v9, %v4558_v13  ;;  %v3373_v63 = vadd.f32 %v3371_v31, %v3261_v32  ;;  %v3604_v2 = vpop.f32.mrf.mxu0  ;;  %v3696_v13 = vrot.slane %v3068_v21, %v4524_v49 }
 0xaa7   : > { %v3609_v27 = vmul.f32 %v3604_v2, %v4539_v56 }
 0xaa8   : > { %v3374_v17 = vadd.f32 %v3372_v38, %v3262_v1  ;;  %v3453_v22 = vadd.f32 %v3451_v7, %v3373_v63  ;;  %v3606_v26 = vpop.f32.mrf.mxu0 }
 0xaa9   : > { %v3610_v51 = vmul.f32 %v3606_v26, %v4549_v61 }
 0xaaa   : > { %v3454_v28 = vadd.f32 %v3452_v18, %v3374_v17 }
 0xaad   : > { %v3526_v14 = vpop.f32.mrf.mxu1 }
 0xaae   : > { %v3531_v60 = vadd.f32 %v3526_v14, %v3453_v22 }
 0xaaf   : > { %v3528_v25 = vpop.f32.mrf.mxu1 }
 0xab0   : > { %v3772_v4 = vpop.f32.mrf.mxu0  ;;  %v3532_v36 = vadd.f32 %v3528_v25, %v3454_v28  ;;  %v3611_v44 = vadd.f32 %v3609_v27, %v3531_v60 }
 0xab2   : > { %v3774_v47 = vpop.f32.mrf.mxu0  ;;  %v3612_v48 = vadd.f32 %v3610_v51, %v3532_v36 }
 0xab3   : > { %v3778_v56 = vmul.f32 0.0, %v3774_v47 }
 0xab6   : > { %v3684_v29 = vpop.f32.mrf.mxu1 }
 0xab7   : > { %v3697_v24 = vmul.f32 %v3684_v29, %v4569_v35 }
 0xab8   : > { %v3686_v37 = vpop.f32.mrf.mxu1 }
 0xab9   : > { %v3698_v46 = vmul.f32 %v3696_v13, %v3686_v37  ;;  %v3699_v52 = vadd.f32 %v3697_v24, %v3611_v44 }
 0xabb   : > { %v3700_v45 = vadd.f32 %v3698_v46, %v3612_v48  ;;  %v3779_v62 = vadd.f32 %v3772_v4, %v3699_v52 }
 0xabd   : > { %v3780_v23 = vadd.f32 %v3778_v56, %v3700_v45 }
 0xabe   : > { %v3852_v59 = vpop.f32.mrf.mxu1 }
 0xabf   : > { %v3865_v5 = vmul.f32 %v3852_v59, %v4577_v50 }
 0xac0   : > { %v3854_v3 = vpop.f32.mrf.mxu1 }
 0xac1   : > { %v3867_v42 = vadd.f32 %v3865_v5, %v3779_v62  ;;  %v3866_v35 = vmul.f32 %v3864_v54, %v3854_v3 }
 0xac3   : > { %v3868_v40 = vadd.f32 %v3866_v35, %v3780_v23  ;;  %v3876_v41 = vadd.f32 %v3874_v6, %v3867_v42 }
 0xac5   : > { %v3877_v11 = vadd.f32 %v3874_v6, %v3868_v40 }
 0xac7   : > { %v3878_v61 = vadd.f32 %v3877_v11, %v3876_v41 }
 0xac9   : > { %3879 = vadd.xlane.f32.xlu0 %v3878_v61 }
 0xb52   : > { %v3880_v33 = vpop.xlane.xlu0 %3879 }
 0xb53   : > { %v3881_v34 = vmul.f32 0.00390625, %v3880_v33 }
 0xb55   : > { %v3882_v43 = vsub.f32 %v3876_v41, %v3881_v34  ;;  %v3883_v10 = vsub.f32 %v3877_v11, %v3881_v34 }
 0xb57   : > { %v3884_v49 = vmul.f32 %v3882_v43, %v3882_v43  ;;  %v3885_v15 = vmul.f32 %v3883_v10, %v3883_v10 }
 0xb59   : > { %v3886_v16 = vadd.f32 %v3885_v15, %v3884_v49 }
 0xb5b   : > { %3887 = vadd.xlane.f32.xlu1 %v3886_v16 }
 0xb6c   : > { %3901 = vperm.xlu1 %4178, %v5215_v53  }
 0xb70   : > { %4179 = vset.pattern.permute.xlu1 %v4302_v30 }
 0xb71   : > { %3909 = vperm.xlu1 %4179, %v5215_v53  }
 0xbe4   : > { %v3888_v50 = vpop.xlane.xlu1 %3887 }
 0xbe5   : > { %v3889_v55 = vmul.f32 0.00390625, %v3888_v50 }
 0xbe7   : > { %v3890_v0 = vadd.f32 1e-05, %v3889_v55 }
 0xbe8   : > { %v3902_v8 = vpop.permute.xlu1 %3901 }
 0xbe9   : > { %4187 = vrsqrt.f32 %v3890_v0 }
 0xbec   : > { %v3910_v31 = vpop.permute.xlu1 %3909 }
 0xbf6   : > { %v4188_v58 = vpop.eup %4187 }
 0xbf7   : > { %v3892_v19 = vmul.f32 %v4188_v58, %v5215_v53 }
 0xbf9   : > { %3895 = vperm.xlu0 %4177, %v3892_v19  }
 0xbfd   : > { %4180 = vset.pattern.permute.xlu0 %v4302_v30 }
 0xc74   : > { %v3896_v9 = vpop.permute.xlu0 %3895 }
 0xc75   : > { %v3898_v20 = vmul.f32 %v3896_v9, %v3882_v43  ;;  %v3899_v12 = vmul.f32 %v3896_v9, %v3883_v10 }
 0xc77   : > { %v3904_v32 = vadd.f32 %v3902_v8, %v3898_v20  ;;  %v3905_v38 = vadd.f32 %v3902_v8, %v3899_v12 }
 0xc79   : > { %vm3906_vm4 = vcmp.ge.f32.partialorder %v3904_v32, 0.0  ;;  %vm3907_vm5 = vcmp.ge.f32.partialorder %v3905_v38, 0.0  ;;  %v3912_v39 = vmul.f32 %v3910_v31, %v3904_v32  ;;  %v3913_v53 = vmul.f32 %v3910_v31, %v3905_v38 }
 0xc7b   : > { %v3914_v30 = vsel %vm3906_vm4, %v3904_v32, %v3912_v39  ;;  %v3915_v1 = vsel %vm3907_vm5, %v3905_v38, %v3913_v53 }
 0xc7c   : > { %3916 = vst [vmem:[%s286_s17] sm:$0xff] %v3914_v30  ;;  %3917 = vst [vmem:[%s286_s17 + $0x8] sm:$0xff] %v3915_v1 }
 0xc7d   : > { %4230 = shalt.err (!%p4227_p0)
}
 0xc7e   : > { %s4231_s15 = scalar_lea.hbm %s5321_s21, 256  ;;  %s4235_s14 = scalar_lea.hbm %s5369_s7, 512 }
 0xc7f   : > { %p4232_p1 = scmp.ne.s32.totalorder %s5321_s21, %s4231_s15  ;;  %p4236_p4 = scmp.lt.s32.totalorder %s5321_s21, %s5369_s7 }
 0xc80   : > { %p4237_p7 = scmp.lt.s32.totalorder %s4235_s14, %s4231_s15 }
 0xc81   : > { %p4233_p2 = pnand %p4232_p1, %p4387_p5 }
 0xc82   : > { %p4238_p8 = por %p4237_p7, %p4236_p4 }
 0xc83   : > { %p4234_p3 = pneg %p4233_p2 }
 0xc85   : > { %p4239_p6 = pnand %p4238_p8, %p4234_p3 }
 0xc87   : > { %4242 = shalt.err (!%p4239_p6)
}
 0xc88   : > { %4094 = dma.vmem_to_hbm [thread:$0]  (%p4387_p5), %s5323_s18, 256, %s5321_s21, %s3919_s28  }
 0xc89 PF: > { %p4106_p9 = scmp.ge.s32.totalorder %s4281_s27, 2  ;;  %s3945_s19 = sand.u32 1, %s4269_s24  }
 0xc8a   : > { %p5373_p10 = scmp.ne.s32.totalorder %s5371_s12, 0  ;;  %s3946_s20 = scalar_lea.sflag [#allocation5], %s3945_s19 }
 0xc8c   : > { %p4101_p11 = pnand %p4106_p9, %p5373_p10 }
 0xc8e   : > { %p4102_p12 = pneg %p4101_p11 }
 0xc90   : > { %4264 = dma.done.wait (%p4102_p12), %s3946_s20, 256  }
 0xc91   : > { %4266 = vsyncadd (%p4102_p12), %s3946_s20, 4294967040  ;;  %p18_p13 = scmp.ge.s32.totalorder %s4374_s30, 4   ;;  %s5374_s24 = smov %s4273_s25 }
 0xc92   : > { %s5375_s25 = smov %s4277_s26  ;;  %s5376_s26 = smov %s4385_s10 }
 0xc93   : > { %s5377_s27 = smov %s4374_s30  ;;  %20 = sbr.rel (!%p18_p13) target bundleno = 4 (0x4), region = 124 }
 0xc98   :  { %3951 = vsyncpa [#allocation4], 1 }
 0xc99   :  { %3953 = vsyncpa [#allocation4 + $0x1], 1 }
 0xc9a   :  { %3954 = vsyncpa [#allocation5], 1 }
 0xc9b   :  { %3956 = vsyncpa [#allocation5 + $0x1], 1 }

</bundles_post_ra>
